<compile_context>
chip_gen: v7x
topology: tpu7x:2x2x1
jax: 0.10.0
libtpu: 0.0.40
codegen_flags: <defaults>
</compile_context>

<pallas_src>
import functools
import math

import jax
import jax.numpy as jnp
from jax.experimental import pallas as pl
from jax.experimental.pallas import tpu as pltpu


LANE = 128
SUBLANE = 8


def _round_up(x, m):
    return ((x + m - 1) // m) * m


# ---------------------------------------------------------------------------
# In-kernel activations (all elementwise math in float32)
# ---------------------------------------------------------------------------
def _elu(y, alpha):
    # exp is evaluated only on the clamped non-positive branch: no inf in the
    # unselected lane, good precision where it matters.
    return jnp.where(y > 0.0, y, alpha * (jnp.exp(jnp.minimum(y, 0.0)) - 1.0))


def _sigmoid(y):
    # exp and reciprocal both route to the EUP slot (essentially free).
    return pl.reciprocal(1.0 + jnp.exp(-y), approx=True)


# ---------------------------------------------------------------------------
# The fused Pallas kernel: whole causal_batle forward for one batch tile
# ---------------------------------------------------------------------------
def _causal_batle_kernel(x_ref,
                         wr1_ref, br1_ref, wr2_ref, br2_ref, wr3_ref, br3_ref,
                         wz_ref, bz_ref, wc_ref, bc_ref, wd_ref, bd_ref,
                         out_ref, *, dims):
    U1P, U2P, U3P, DP = dims
    f32 = jnp.float32
    x = x_ref[...].astype(f32)

    # ---- backbone representation trunk: 3 x (Linear -> ELU(alpha=1)) -------
    z = _elu(jnp.dot(x, wr1_ref[...], preferred_element_type=f32) + br1_ref[...], 1.0)
    z = _elu(jnp.dot(z, wr2_ref[...], preferred_element_type=f32) + br2_ref[...], 1.0)
    z = _elu(jnp.dot(z, wr3_ref[...], preferred_element_type=f32) + br3_ref[...], 1.0)

    # ---- stage B: all five consumers of z fused into ONE matmul ------------
    # columns: [head2_1_0 | head2_1_1 | t_pred | head_d | decoder_layer1_1]
    sb = jnp.dot(z, wz_ref[...], preferred_element_type=f32) + bz_ref[...]
    o = 0
    h10 = _elu(sb[:, o:o + U2P], 0.25); o += U2P     # head_layer2_1_0 + ELU(0.25)
    h11 = _elu(sb[:, o:o + U2P], 0.25); o += U2P     # head_layer2_1_1 + ELU(0.25)
    t_out = sb[:, o:o + U3P];           o += U3P     # t_predictions (logits)
    d_hid = sb[:, o:o + U2P];           o += U2P     # head_layer_d (no activation)
    dec1 = _elu(sb[:, o:o + U1P], 1.0)               # decoder_layer1_1 + ELU

    # ---- stage C: block-diagonal second-stage matmul ------------------------
    # blocks: [head2_2_0 | head2_2_1 | d_predictions | decoder_layer1_2]
    sc_in = jnp.concatenate([h10, h11, d_hid, dec1], axis=1)
    sc = jnp.dot(sc_in, wc_ref[...], preferred_element_type=f32) + bc_ref[...]
    o = 0
    y0h = _elu(sc[:, o:o + U2P], 0.25); o += U2P     # head_layer2_2_0 + ELU(0.25)
    y1h = _elu(sc[:, o:o + U2P], 0.25); o += U2P     # head_layer2_2_1 + ELU(0.25)
    d_raw = sc[:, o:o + U3P];           o += U3P     # d_predictions (pre-sigmoid)
    dec2 = _elu(sc[:, o:o + U1P], 1.0)               # decoder_layer1_2 + ELU

    # ---- stage D: block-diagonal final matmul --------------------------------
    # blocks: [outcome_layer_0 | outcome_layer_1 | decoder_layer1_3]
    sd_in = jnp.concatenate([y0h, y1h, dec2], axis=1)
    sd = jnp.dot(sd_in, wd_ref[...], preferred_element_type=f32) + bd_ref[...]
    o = 0
    y0 = sd[:, o:o + U3P]; o += U3P                  # outcome_layer_0 (Normal mean)
    y1 = sd[:, o:o + U3P]; o += U3P                  # outcome_layer_1 (Normal mean)
    xr = sd[:, o:o + DP]                             # x reconstruction

    d_out = _sigmoid(d_raw)

    # Single lane-dense output slab: [y0 | y1 | t | d | xr]
    out_ref[...] = jnp.concatenate([y0, y1, t_out, d_out, xr],
                                   axis=1).astype(out_ref.dtype)


# ---------------------------------------------------------------------------
# Deterministic parameter construction (matches shapes of the PyTorch module)
# ---------------------------------------------------------------------------
def _init_linear(key, fan_in, fan_out):
    kw, kb = jax.random.split(key)
    bound = 1.0 / math.sqrt(fan_in)
    w = jax.random.uniform(kw, (fan_in, fan_out), jnp.float32, -bound, bound)
    b = jax.random.uniform(kb, (1, fan_out), jnp.float32, -bound, bound)
    return w, b


def init_causal_batle_params(key, n_covariates, units1, units2, units3):
    names_shapes = [
        # dragonnet backbone representation trunk
        ("rep1", n_covariates, units1),
        ("rep2", units1, units1),
        ("rep3", units1, units1),
        # causal_batle_head
        ("head2_1_0", units1, units2),
        ("head2_2_0", units2, units2),
        ("head2_1_1", units1, units2),
        ("head2_2_1", units2, units2),
        ("outcome_0", units2, units3),
        ("outcome_1", units2, units3),
        ("t_pred", units1, units3),
        ("head_d", units1, units2),
        ("d_pred", units2, 1),
        # decoder (is_Image=False -> last layer maps to n_covariates)
        ("dec1", units1, units1),
        ("dec2", units1, units1),
        ("dec3", units1, n_covariates),
    ]
    params = {}
    keys = jax.random.split(key, len(names_shapes) + 1)
    for k, (name, fi, fo) in zip(keys[:-1], names_shapes):
        params[name] = _init_linear(k, fi, fo)
    # epsilon_weight ~ torch.rand([1]); t_weight = 2.0
    params["epsilon_weight"] = jax.random.uniform(keys[-1], (1,), jnp.float32)
    params["t_weight"] = jnp.array([2.0], jnp.float32)
    return params


# ---------------------------------------------------------------------------
# Host-side packing: pad to 128-lane multiples, concat / block-diag the heads
# ---------------------------------------------------------------------------
def _pad_to(a, rows, cols):
    out = jnp.zeros((rows, cols), jnp.float32)
    return out.at[:a.shape[0], :a.shape[1]].set(a.astype(jnp.float32))


def _block_diag(params, blocks):
    rtot = sum(rp for _, rp, _ in blocks)
    ctot = sum(cp for _, _, cp in blocks)
    W = jnp.zeros((rtot, ctot), jnp.float32)
    B = jnp.zeros((1, ctot), jnp.float32)
    r = c = 0
    for name, rp, cp in blocks:
        w, b = params[name]
        W = W.at[r:r + w.shape[0], c:c + w.shape[1]].set(w.astype(jnp.float32))
        B = B.at[:, c:c + b.shape[1]].set(b.astype(jnp.float32))
        r += rp
        c += cp
    return W, B


def pack_causal_batle_params(params, n_covariates, units1, units2, units3):
    DP = _round_up(n_covariates, LANE)
    U1P = _round_up(units1, LANE)
    U2P = _round_up(units2, LANE)
    U3P = _round_up(units3, LANE)
    dims = (U1P, U2P, U3P, DP)

    packed = {}
    # backbone trunk
    packed["wr1"], packed["br1"] = (_pad_to(params["rep1"][0], DP, U1P),
                                    _pad_to(params["rep1"][1], 1, U1P))
    packed["wr2"], packed["br2"] = (_pad_to(params["rep2"][0], U1P, U1P),
                                    _pad_to(params["rep2"][1], 1, U1P))
    packed["wr3"], packed["br3"] = (_pad_to(params["rep3"][0], U1P, U1P),
                                    _pad_to(params["rep3"][1], 1, U1P))

    # stage B: all consumers of z, column-concatenated (each section 128-padded)
    segs = [("head2_1_0", U2P), ("head2_1_1", U2P), ("t_pred", U3P),
            ("head_d", U2P), ("dec1", U1P)]
    packed["wz"] = jnp.concatenate(
        [_pad_to(params[n][0], U1P, cp) for n, cp in segs], axis=1)
    packed["bz"] = jnp.concatenate(
        [_pad_to(params[n][1], 1, cp) for n, cp in segs], axis=1)

    # stage C: block-diagonal second-stage weights
    cblocks = [("head2_2_0", U2P, U2P), ("head2_2_1", U2P, U2P),
               ("d_pred", U2P, U3P), ("dec2", U1P, U1P)]
    packed["wc"], packed["bc"] = _block_diag(params, cblocks)

    # stage D: block-diagonal final-stage weights
    dblocks = [("outcome_0", U2P, U3P), ("outcome_1", U2P, U3P),
               ("dec3", U1P, DP)]
    packed["wd"], packed["bd"] = _block_diag(params, dblocks)

    packed["epsilon_weight"] = params["epsilon_weight"]
    packed["t_weight"] = params["t_weight"]
    return packed, dims


# ---------------------------------------------------------------------------
# Forward pass: one pallas_call, batch-tiled with a parallel grid axis
# ---------------------------------------------------------------------------
_WEIGHT_NAMES = ("wr1", "br1", "wr2", "br2", "wr3", "br3",
                 "wz", "bz", "wc", "bc", "wd", "bd")


def causal_batle_forward(packed, dims, x, n_covariates, units1, units2, units3,
                         *, tile_batch=256):
    U1P, U2P, U3P, DP = dims
    B = x.shape[0]
    OUT_W = 4 * U3P + DP   # [y0 | y1 | t | d | xr] sections

    # batch tile: multiple of 8 sublanes, capped so VMEM stays well under the
    # 32 MiB scoped default (re-derived per call; safe on v7x's 64 MiB VMEM).
    TB = min(tile_batch, _round_up(B, SUBLANE))
    TB = _round_up(TB, SUBLANE)
    B_pad = _round_up(B, TB)

    x_pad = jnp.zeros((B_pad, DP), jnp.float32)
    x_pad = x_pad.at[:B, :n_covariates].set(x.astype(jnp.float32))

    weights = [packed[n] for n in _WEIGHT_NAMES]

    in_specs = [pl.BlockSpec((TB, DP), lambda i: (i, 0))]
    in_specs += [pl.BlockSpec(w.shape, lambda i: (0, 0)) for w in weights]

    kernel = functools.partial(_causal_batle_kernel, dims=dims)
    out = pl.pallas_call(
        kernel,
        grid=(B_pad // TB,),
        in_specs=in_specs,
        out_specs=pl.BlockSpec((TB, OUT_W), lambda i: (i, 0)),
        out_shape=jax.ShapeDtypeStruct((B_pad, OUT_W), jnp.float32),
        compiler_params=pltpu.CompilerParams(
            dimension_semantics=("parallel",)),
    )(x_pad, *weights)

    # slice the lane-dense output slab back into the named outputs
    y0 = out[:B, 0:units3]
    y1 = out[:B, U3P:U3P + units3]
    t = out[:B, 2 * U3P:2 * U3P + units3]
    d = out[:B, 3 * U3P:3 * U3P + 1]
    xr = out[:B, 4 * U3P:4 * U3P + n_covariates]

    epsilon = packed["epsilon_weight"] * jnp.ones((B,), jnp.float32)
    t_weight = packed["t_weight"] * jnp.ones((B,), jnp.float32)

    return {"y0": y0, "y1": y1, "t": t, "d": d, "xr": xr,
            "epsilon": epsilon, "t_weight": t_weight}


# ---------------------------------------------------------------------------
if __name__ == "__main__":
    # Small shapes consistent with the module (tabular input, is_Image=False).
    batch = 4
    n_covariates = 8
    units1, units2, units3 = 32, 16, 1

    key = jax.random.PRNGKey(0)
    k_x, k_p = jax.random.split(key)
    x = jax.random.normal(k_x, (batch, n_covariates), jnp.float32)

    params = init_causal_batle_params(k_p, n_covariates, units1, units2, units3)
    packed, dims = pack_causal_batle_params(params, n_covariates,
                                            units1, units2, units3)

    fwd = jax.jit(functools.partial(
        causal_batle_forward, packed, dims,
        n_covariates=n_covariates, units1=units1, units2=units2, units3=units3))

    out = fwd(x)
    out = jax.tree_util.tree_map(jax.block_until_ready, out)

    # sanity on shapes
    assert out["y0"].shape == (batch, units3)
    assert out["y1"].shape == (batch, units3)
    assert out["t"].shape == (batch, units3)
    assert out["d"].shape == (batch, 1)
    assert out["xr"].shape == (batch, n_covariates)
    assert out["epsilon"].shape == (batch,)
    assert out["t_weight"].shape == (batch,)

    print("KERNEL_OK")
</pallas_src>

<mosaic_0001>
module attributes {stable_mosaic.version = 11 : i64} {
  func.func @_causal_batle_kernel(%arg0: i32, %arg1: memref<8x128xf32, #tpu.memory_space<vmem>>, %arg2: memref<128x128xf32, #tpu.memory_space<vmem>>, %arg3: memref<1x128xf32, #tpu.memory_space<vmem>>, %arg4: memref<128x128xf32, #tpu.memory_space<vmem>>, %arg5: memref<1x128xf32, #tpu.memory_space<vmem>>, %arg6: memref<128x128xf32, #tpu.memory_space<vmem>>, %arg7: memref<1x128xf32, #tpu.memory_space<vmem>>, %arg8: memref<128x640xf32, #tpu.memory_space<vmem>>, %arg9: memref<1x640xf32, #tpu.memory_space<vmem>>, %arg10: memref<512x512xf32, #tpu.memory_space<vmem>>, %arg11: memref<1x512xf32, #tpu.memory_space<vmem>>, %arg12: memref<384x384xf32, #tpu.memory_space<vmem>>, %arg13: memref<1x384xf32, #tpu.memory_space<vmem>>, %arg14: memref<8x640xf32, #tpu.memory_space<vmem>>) attributes {dimension_semantics = [#tpu.dimension_semantics<parallel>], iteration_bounds = array<i64: 1>, scalar_prefetch = 0 : i64, scratch_operands = 0 : i64, tpu.core_type = #tpu.core_type<tc>, window_params = [{transform_indices = @transform_0, window_bounds = array<i64: 8, 128>}, {pipeline_mode = #tpu.pipeline_mode<synchronous>, transform_indices = @transform_1, window_bounds = array<i64: 128, 128>}, {pipeline_mode = #tpu.pipeline_mode<synchronous>, transform_indices = @transform_2, window_bounds = array<i64: 1, 128>}, {pipeline_mode = #tpu.pipeline_mode<synchronous>, transform_indices = @transform_3, window_bounds = array<i64: 128, 128>}, {pipeline_mode = #tpu.pipeline_mode<synchronous>, transform_indices = @transform_4, window_bounds = array<i64: 1, 128>}, {pipeline_mode = #tpu.pipeline_mode<synchronous>, transform_indices = @transform_5, window_bounds = array<i64: 128, 128>}, {pipeline_mode = #tpu.pipeline_mode<synchronous>, transform_indices = @transform_6, window_bounds = array<i64: 1, 128>}, {pipeline_mode = #tpu.pipeline_mode<synchronous>, transform_indices = @transform_7, window_bounds = array<i64: 128, 640>}, {pipeline_mode = #tpu.pipeline_mode<synchronous>, transform_indices = @transform_8, window_bounds = array<i64: 1, 640>}, {pipeline_mode = #tpu.pipeline_mode<synchronous>, transform_indices = @transform_9, window_bounds = array<i64: 512, 512>}, {pipeline_mode = #tpu.pipeline_mode<synchronous>, transform_indices = @transform_10, window_bounds = array<i64: 1, 512>}, {pipeline_mode = #tpu.pipeline_mode<synchronous>, transform_indices = @transform_11, window_bounds = array<i64: 384, 384>}, {pipeline_mode = #tpu.pipeline_mode<synchronous>, transform_indices = @transform_12, window_bounds = array<i64: 1, 384>}, {transform_indices = @transform_13, window_bounds = array<i64: 8, 640>}]} {
    %c0 = arith.constant 0 : index
    %c0_0 = arith.constant 0 : index
    %0 = vector.load %arg1[%c0, %c0_0] : memref<8x128xf32, #tpu.memory_space<vmem>>, vector<8x128xf32>
    %c0_1 = arith.constant 0 : index
    %c0_2 = arith.constant 0 : index
    %1 = vector.load %arg2[%c0_1, %c0_2] : memref<128x128xf32, #tpu.memory_space<vmem>>, vector<128x128xf32>
    %cst = arith.constant dense<0.000000e+00> : vector<8x128xf32>
    %2 = tpu.matmul %0, %1, %cst {dimension_numbers = #tpu.dot_dimension_numbers<[1], [0], [0], [1], [0, 0, 1, 1], [], []>} : vector<8x128xf32>, vector<128x128xf32>, vector<8x128xf32> -> vector<8x128xf32>
    %c0_3 = arith.constant 0 : index
    %c0_4 = arith.constant 0 : index
    %3 = vector.load %arg3[%c0_3, %c0_4] : memref<1x128xf32, #tpu.memory_space<vmem>>, vector<1x128xf32>
    %4 = vector.broadcast %3 : vector<1x128xf32> to vector<8x128xf32>
    %5 = arith.addf %2, %4 : vector<8x128xf32>
    %cst_5 = arith.constant 0.000000e+00 : f32
    %6 = vector.broadcast %cst_5 : f32 to vector<8x128xf32>
    %7 = arith.cmpf ogt, %5, %6 : vector<8x128xf32>
    %cst_6 = arith.constant 0.000000e+00 : f32
    %8 = vector.broadcast %cst_6 : f32 to vector<8x128xf32>
    %9 = arith.minimumf %5, %8 : vector<8x128xf32>
    %10 = math.exp %9 : vector<8x128xf32>
    %cst_7 = arith.constant 1.000000e+00 : f32
    %11 = vector.broadcast %cst_7 : f32 to vector<8x128xf32>
    %12 = arith.subf %10, %11 : vector<8x128xf32>
    %cst_8 = arith.constant 1.000000e+00 : f32
    %13 = vector.broadcast %cst_8 : f32 to vector<8x128xf32>
    %14 = arith.mulf %13, %12 : vector<8x128xf32>
    %15 = arith.select %7, %5, %14 : vector<8x128xi1>, vector<8x128xf32>
    %c0_9 = arith.constant 0 : index
    %c0_10 = arith.constant 0 : index
    %16 = vector.load %arg4[%c0_9, %c0_10] : memref<128x128xf32, #tpu.memory_space<vmem>>, vector<128x128xf32>
    %cst_11 = arith.constant dense<0.000000e+00> : vector<8x128xf32>
    %17 = tpu.matmul %15, %16, %cst_11 {dimension_numbers = #tpu.dot_dimension_numbers<[1], [0], [0], [1], [0, 0, 1, 1], [], []>} : vector<8x128xf32>, vector<128x128xf32>, vector<8x128xf32> -> vector<8x128xf32>
    %c0_12 = arith.constant 0 : index
    %c0_13 = arith.constant 0 : index
    %18 = vector.load %arg5[%c0_12, %c0_13] : memref<1x128xf32, #tpu.memory_space<vmem>>, vector<1x128xf32>
    %19 = vector.broadcast %18 : vector<1x128xf32> to vector<8x128xf32>
    %20 = arith.addf %17, %19 : vector<8x128xf32>
    %cst_14 = arith.constant 0.000000e+00 : f32
    %21 = vector.broadcast %cst_14 : f32 to vector<8x128xf32>
    %22 = arith.cmpf ogt, %20, %21 : vector<8x128xf32>
    %cst_15 = arith.constant 0.000000e+00 : f32
    %23 = vector.broadcast %cst_15 : f32 to vector<8x128xf32>
    %24 = arith.minimumf %20, %23 : vector<8x128xf32>
    %25 = math.exp %24 : vector<8x128xf32>
    %cst_16 = arith.constant 1.000000e+00 : f32
    %26 = vector.broadcast %cst_16 : f32 to vector<8x128xf32>
    %27 = arith.subf %25, %26 : vector<8x128xf32>
    %cst_17 = arith.constant 1.000000e+00 : f32
    %28 = vector.broadcast %cst_17 : f32 to vector<8x128xf32>
    %29 = arith.mulf %28, %27 : vector<8x128xf32>
    %30 = arith.select %22, %20, %29 : vector<8x128xi1>, vector<8x128xf32>
    %c0_18 = arith.constant 0 : index
    %c0_19 = arith.constant 0 : index
    %31 = vector.load %arg6[%c0_18, %c0_19] : memref<128x128xf32, #tpu.memory_space<vmem>>, vector<128x128xf32>
    %cst_20 = arith.constant dense<0.000000e+00> : vector<8x128xf32>
    %32 = tpu.matmul %30, %31, %cst_20 {dimension_numbers = #tpu.dot_dimension_numbers<[1], [0], [0], [1], [0, 0, 1, 1], [], []>} : vector<8x128xf32>, vector<128x128xf32>, vector<8x128xf32> -> vector<8x128xf32>
    %c0_21 = arith.constant 0 : index
    %c0_22 = arith.constant 0 : index
    %33 = vector.load %arg7[%c0_21, %c0_22] : memref<1x128xf32, #tpu.memory_space<vmem>>, vector<1x128xf32>
    %34 = vector.broadcast %33 : vector<1x128xf32> to vector<8x128xf32>
    %35 = arith.addf %32, %34 : vector<8x128xf32>
    %cst_23 = arith.constant 0.000000e+00 : f32
    %36 = vector.broadcast %cst_23 : f32 to vector<8x128xf32>
    %37 = arith.cmpf ogt, %35, %36 : vector<8x128xf32>
    %cst_24 = arith.constant 0.000000e+00 : f32
    %38 = vector.broadcast %cst_24 : f32 to vector<8x128xf32>
    %39 = arith.minimumf %35, %38 : vector<8x128xf32>
    %40 = math.exp %39 : vector<8x128xf32>
    %cst_25 = arith.constant 1.000000e+00 : f32
    %41 = vector.broadcast %cst_25 : f32 to vector<8x128xf32>
    %42 = arith.subf %40, %41 : vector<8x128xf32>
    %cst_26 = arith.constant 1.000000e+00 : f32
    %43 = vector.broadcast %cst_26 : f32 to vector<8x128xf32>
    %44 = arith.mulf %43, %42 : vector<8x128xf32>
    %45 = arith.select %37, %35, %44 : vector<8x128xi1>, vector<8x128xf32>
    %c0_27 = arith.constant 0 : index
    %c0_28 = arith.constant 0 : index
    %46 = vector.load %arg8[%c0_27, %c0_28] : memref<128x640xf32, #tpu.memory_space<vmem>>, vector<128x640xf32>
    %cst_29 = arith.constant dense<0.000000e+00> : vector<8x640xf32>
    %47 = tpu.matmul %45, %46, %cst_29 {dimension_numbers = #tpu.dot_dimension_numbers<[1], [0], [0], [1], [0, 0, 1, 1], [], []>} : vector<8x128xf32>, vector<128x640xf32>, vector<8x640xf32> -> vector<8x640xf32>
    %c0_30 = arith.constant 0 : index
    %c0_31 = arith.constant 0 : index
    %48 = vector.load %arg9[%c0_30, %c0_31] : memref<1x640xf32, #tpu.memory_space<vmem>>, vector<1x640xf32>
    %49 = vector.broadcast %48 : vector<1x640xf32> to vector<8x640xf32>
    %50 = arith.addf %47, %49 : vector<8x640xf32>
    %51 = vector.extract_strided_slice %50 {offsets = [0, 0], sizes = [8, 128], strides = [1, 1]} : vector<8x640xf32> to vector<8x128xf32>
    %cst_32 = arith.constant 0.000000e+00 : f32
    %52 = vector.broadcast %cst_32 : f32 to vector<8x128xf32>
    %53 = arith.cmpf ogt, %51, %52 : vector<8x128xf32>
    %cst_33 = arith.constant 0.000000e+00 : f32
    %54 = vector.broadcast %cst_33 : f32 to vector<8x128xf32>
    %55 = arith.minimumf %51, %54 : vector<8x128xf32>
    %56 = math.exp %55 : vector<8x128xf32>
    %cst_34 = arith.constant 1.000000e+00 : f32
    %57 = vector.broadcast %cst_34 : f32 to vector<8x128xf32>
    %58 = arith.subf %56, %57 : vector<8x128xf32>
    %cst_35 = arith.constant 2.500000e-01 : f32
    %59 = vector.broadcast %cst_35 : f32 to vector<8x128xf32>
    %60 = arith.mulf %59, %58 : vector<8x128xf32>
    %61 = arith.select %53, %51, %60 : vector<8x128xi1>, vector<8x128xf32>
    %62 = vector.extract_strided_slice %50 {offsets = [0, 128], sizes = [8, 128], strides = [1, 1]} : vector<8x640xf32> to vector<8x128xf32>
    %cst_36 = arith.constant 0.000000e+00 : f32
    %63 = vector.broadcast %cst_36 : f32 to vector<8x128xf32>
    %64 = arith.cmpf ogt, %62, %63 : vector<8x128xf32>
    %cst_37 = arith.constant 0.000000e+00 : f32
    %65 = vector.broadcast %cst_37 : f32 to vector<8x128xf32>
    %66 = arith.minimumf %62, %65 : vector<8x128xf32>
    %67 = math.exp %66 : vector<8x128xf32>
    %cst_38 = arith.constant 1.000000e+00 : f32
    %68 = vector.broadcast %cst_38 : f32 to vector<8x128xf32>
    %69 = arith.subf %67, %68 : vector<8x128xf32>
    %cst_39 = arith.constant 2.500000e-01 : f32
    %70 = vector.broadcast %cst_39 : f32 to vector<8x128xf32>
    %71 = arith.mulf %70, %69 : vector<8x128xf32>
    %72 = arith.select %64, %62, %71 : vector<8x128xi1>, vector<8x128xf32>
    %73 = vector.extract_strided_slice %50 {offsets = [0, 256], sizes = [8, 128], strides = [1, 1]} : vector<8x640xf32> to vector<8x128xf32>
    %74 = vector.extract_strided_slice %50 {offsets = [0, 384], sizes = [8, 128], strides = [1, 1]} : vector<8x640xf32> to vector<8x128xf32>
    %75 = vector.extract_strided_slice %50 {offsets = [0, 512], sizes = [8, 128], strides = [1, 1]} : vector<8x640xf32> to vector<8x128xf32>
    %cst_40 = arith.constant 0.000000e+00 : f32
    %76 = vector.broadcast %cst_40 : f32 to vector<8x128xf32>
    %77 = arith.cmpf ogt, %75, %76 : vector<8x128xf32>
    %cst_41 = arith.constant 0.000000e+00 : f32
    %78 = vector.broadcast %cst_41 : f32 to vector<8x128xf32>
    %79 = arith.minimumf %75, %78 : vector<8x128xf32>
    %80 = math.exp %79 : vector<8x128xf32>
    %cst_42 = arith.constant 1.000000e+00 : f32
    %81 = vector.broadcast %cst_42 : f32 to vector<8x128xf32>
    %82 = arith.subf %80, %81 : vector<8x128xf32>
    %cst_43 = arith.constant 1.000000e+00 : f32
    %83 = vector.broadcast %cst_43 : f32 to vector<8x128xf32>
    %84 = arith.mulf %83, %82 : vector<8x128xf32>
    %85 = arith.select %77, %75, %84 : vector<8x128xi1>, vector<8x128xf32>
    %86 = tpu.concatenate %61, %72, %74, %85 in 1 : vector<8x128xf32>, vector<8x128xf32>, vector<8x128xf32>, vector<8x128xf32> -> vector<8x512xf32>
    %c0_44 = arith.constant 0 : index
    %c0_45 = arith.constant 0 : index
    %87 = vector.load %arg10[%c0_44, %c0_45] : memref<512x512xf32, #tpu.memory_space<vmem>>, vector<512x512xf32>
    %cst_46 = arith.constant dense<0.000000e+00> : vector<8x512xf32>
    %88 = tpu.matmul %86, %87, %cst_46 {dimension_numbers = #tpu.dot_dimension_numbers<[1], [0], [0], [1], [0, 0, 1, 1], [], []>} : vector<8x512xf32>, vector<512x512xf32>, vector<8x512xf32> -> vector<8x512xf32>
    %c0_47 = arith.constant 0 : index
    %c0_48 = arith.constant 0 : index
    %89 = vector.load %arg11[%c0_47, %c0_48] : memref<1x512xf32, #tpu.memory_space<vmem>>, vector<1x512xf32>
    %90 = vector.broadcast %89 : vector<1x512xf32> to vector<8x512xf32>
    %91 = arith.addf %88, %90 : vector<8x512xf32>
    %92 = vector.extract_strided_slice %91 {offsets = [0, 0], sizes = [8, 128], strides = [1, 1]} : vector<8x512xf32> to vector<8x128xf32>
    %cst_49 = arith.constant 0.000000e+00 : f32
    %93 = vector.broadcast %cst_49 : f32 to vector<8x128xf32>
    %94 = arith.cmpf ogt, %92, %93 : vector<8x128xf32>
    %cst_50 = arith.constant 0.000000e+00 : f32
    %95 = vector.broadcast %cst_50 : f32 to vector<8x128xf32>
    %96 = arith.minimumf %92, %95 : vector<8x128xf32>
    %97 = math.exp %96 : vector<8x128xf32>
    %cst_51 = arith.constant 1.000000e+00 : f32
    %98 = vector.broadcast %cst_51 : f32 to vector<8x128xf32>
    %99 = arith.subf %97, %98 : vector<8x128xf32>
    %cst_52 = arith.constant 2.500000e-01 : f32
    %100 = vector.broadcast %cst_52 : f32 to vector<8x128xf32>
    %101 = arith.mulf %100, %99 : vector<8x128xf32>
    %102 = arith.select %94, %92, %101 : vector<8x128xi1>, vector<8x128xf32>
    %103 = vector.extract_strided_slice %91 {offsets = [0, 128], sizes = [8, 128], strides = [1, 1]} : vector<8x512xf32> to vector<8x128xf32>
    %cst_53 = arith.constant 0.000000e+00 : f32
    %104 = vector.broadcast %cst_53 : f32 to vector<8x128xf32>
    %105 = arith.cmpf ogt, %103, %104 : vector<8x128xf32>
    %cst_54 = arith.constant 0.000000e+00 : f32
    %106 = vector.broadcast %cst_54 : f32 to vector<8x128xf32>
    %107 = arith.minimumf %103, %106 : vector<8x128xf32>
    %108 = math.exp %107 : vector<8x128xf32>
    %cst_55 = arith.constant 1.000000e+00 : f32
    %109 = vector.broadcast %cst_55 : f32 to vector<8x128xf32>
    %110 = arith.subf %108, %109 : vector<8x128xf32>
    %cst_56 = arith.constant 2.500000e-01 : f32
    %111 = vector.broadcast %cst_56 : f32 to vector<8x128xf32>
    %112 = arith.mulf %111, %110 : vector<8x128xf32>
    %113 = arith.select %105, %103, %112 : vector<8x128xi1>, vector<8x128xf32>
    %114 = vector.extract_strided_slice %91 {offsets = [0, 256], sizes = [8, 128], strides = [1, 1]} : vector<8x512xf32> to vector<8x128xf32>
    %115 = vector.extract_strided_slice %91 {offsets = [0, 384], sizes = [8, 128], strides = [1, 1]} : vector<8x512xf32> to vector<8x128xf32>
    %cst_57 = arith.constant 0.000000e+00 : f32
    %116 = vector.broadcast %cst_57 : f32 to vector<8x128xf32>
    %117 = arith.cmpf ogt, %115, %116 : vector<8x128xf32>
    %cst_58 = arith.constant 0.000000e+00 : f32
    %118 = vector.broadcast %cst_58 : f32 to vector<8x128xf32>
    %119 = arith.minimumf %115, %118 : vector<8x128xf32>
    %120 = math.exp %119 : vector<8x128xf32>
    %cst_59 = arith.constant 1.000000e+00 : f32
    %121 = vector.broadcast %cst_59 : f32 to vector<8x128xf32>
    %122 = arith.subf %120, %121 : vector<8x128xf32>
    %cst_60 = arith.constant 1.000000e+00 : f32
    %123 = vector.broadcast %cst_60 : f32 to vector<8x128xf32>
    %124 = arith.mulf %123, %122 : vector<8x128xf32>
    %125 = arith.select %117, %115, %124 : vector<8x128xi1>, vector<8x128xf32>
    %126 = tpu.concatenate %102, %113, %125 in 1 : vector<8x128xf32>, vector<8x128xf32>, vector<8x128xf32> -> vector<8x384xf32>
    %c0_61 = arith.constant 0 : index
    %c0_62 = arith.constant 0 : index
    %127 = vector.load %arg12[%c0_61, %c0_62] : memref<384x384xf32, #tpu.memory_space<vmem>>, vector<384x384xf32>
    %cst_63 = arith.constant dense<0.000000e+00> : vector<8x384xf32>
    %128 = tpu.matmul %126, %127, %cst_63 {dimension_numbers = #tpu.dot_dimension_numbers<[1], [0], [0], [1], [0, 0, 1, 1], [], []>} : vector<8x384xf32>, vector<384x384xf32>, vector<8x384xf32> -> vector<8x384xf32>
    %c0_64 = arith.constant 0 : index
    %c0_65 = arith.constant 0 : index
    %129 = vector.load %arg13[%c0_64, %c0_65] : memref<1x384xf32, #tpu.memory_space<vmem>>, vector<1x384xf32>
    %130 = vector.broadcast %129 : vector<1x384xf32> to vector<8x384xf32>
    %131 = arith.addf %128, %130 : vector<8x384xf32>
    %132 = vector.extract_strided_slice %131 {offsets = [0, 0], sizes = [8, 128], strides = [1, 1]} : vector<8x384xf32> to vector<8x128xf32>
    %133 = vector.extract_strided_slice %131 {offsets = [0, 128], sizes = [8, 128], strides = [1, 1]} : vector<8x384xf32> to vector<8x128xf32>
    %134 = vector.extract_strided_slice %131 {offsets = [0, 256], sizes = [8, 128], strides = [1, 1]} : vector<8x384xf32> to vector<8x128xf32>
    %cst_66 = arith.constant 0.000000e+00 : f32
    %135 = vector.broadcast %cst_66 : f32 to vector<8x128xf32>
    %136 = arith.subf %135, %114 : vector<8x128xf32>
    %137 = math.exp %136 : vector<8x128xf32>
    %cst_67 = arith.constant 1.000000e+00 : f32
    %138 = vector.broadcast %cst_67 : f32 to vector<8x128xf32>
    %139 = arith.addf %138, %137 : vector<8x128xf32>
    %140 = tpu.reciprocal %139 {approx = true} : vector<8x128xf32> -> vector<8x128xf32>
    %141 = tpu.concatenate %132, %133, %73, %140, %134 in 1 : vector<8x128xf32>, vector<8x128xf32>, vector<8x128xf32>, vector<8x128xf32>, vector<8x128xf32> -> vector<8x640xf32>
    %c0_68 = arith.constant 0 : index
    %c0_69 = arith.constant 0 : index
    %142 = vector.load %arg14[%c0_68, %c0_69] : memref<8x640xf32, #tpu.memory_space<vmem>>, vector<8x640xf32>
    tpu.vector_store %arg14[%c0_68, %c0_69], %141 {strides = array<i32>} : memref<8x640xf32, #tpu.memory_space<vmem>>, vector<8x640xf32>,
    return
  }
  func.func @transform_0(%arg0: i32) -> (i32, i32) {
    %c0_i32 = arith.constant 0 : i32
    %c0_i32_0 = arith.constant 0 : i32
    return %arg0, %c0_i32 : i32, i32
  }
  func.func @transform_1(%arg0: i32) -> (i32, i32) {
    %c0_i32 = arith.constant 0 : i32
    %c0_i32_0 = arith.constant 0 : i32
    %c0_i32_1 = arith.constant 0 : i32
    return %c0_i32, %c0_i32_0 : i32, i32
  }
  func.func @transform_2(%arg0: i32) -> (i32, i32) {
    %c0_i32 = arith.constant 0 : i32
    %c0_i32_0 = arith.constant 0 : i32
    %c0_i32_1 = arith.constant 0 : i32
    return %c0_i32, %c0_i32_0 : i32, i32
  }
  func.func @transform_3(%arg0: i32) -> (i32, i32) {
    %c0_i32 = arith.constant 0 : i32
    %c0_i32_0 = arith.constant 0 : i32
    %c0_i32_1 = arith.constant 0 : i32
    return %c0_i32, %c0_i32_0 : i32, i32
  }
  func.func @transform_4(%arg0: i32) -> (i32, i32) {
    %c0_i32 = arith.constant 0 : i32
    %c0_i32_0 = arith.constant 0 : i32
    %c0_i32_1 = arith.constant 0 : i32
    return %c0_i32, %c0_i32_0 : i32, i32
  }
  func.func @transform_5(%arg0: i32) -> (i32, i32) {
    %c0_i32 = arith.constant 0 : i32
    %c0_i32_0 = arith.constant 0 : i32
    %c0_i32_1 = arith.constant 0 : i32
    return %c0_i32, %c0_i32_0 : i32, i32
  }
  func.func @transform_6(%arg0: i32) -> (i32, i32) {
    %c0_i32 = arith.constant 0 : i32
    %c0_i32_0 = arith.constant 0 : i32
    %c0_i32_1 = arith.constant 0 : i32
    return %c0_i32, %c0_i32_0 : i32, i32
  }
  func.func @transform_7(%arg0: i32) -> (i32, i32) {
    %c0_i32 = arith.constant 0 : i32
    %c0_i32_0 = arith.constant 0 : i32
    %c0_i32_1 = arith.constant 0 : i32
    return %c0_i32, %c0_i32_0 : i32, i32
  }
  func.func @transform_8(%arg0: i32) -> (i32, i32) {
    %c0_i32 = arith.constant 0 : i32
    %c0_i32_0 = arith.constant 0 : i32
    %c0_i32_1 = arith.constant 0 : i32
    return %c0_i32, %c0_i32_0 : i32, i32
  }
  func.func @transform_9(%arg0: i32) -> (i32, i32) {
    %c0_i32 = arith.constant 0 : i32
    %c0_i32_0 = arith.constant 0 : i32
    %c0_i32_1 = arith.constant 0 : i32
    return %c0_i32, %c0_i32_0 : i32, i32
  }
  func.func @transform_10(%arg0: i32) -> (i32, i32) {
    %c0_i32 = arith.constant 0 : i32
    %c0_i32_0 = arith.constant 0 : i32
    %c0_i32_1 = arith.constant 0 : i32
    return %c0_i32, %c0_i32_0 : i32, i32
  }
  func.func @transform_11(%arg0: i32) -> (i32, i32) {
    %c0_i32 = arith.constant 0 : i32
    %c0_i32_0 = arith.constant 0 : i32
    %c0_i32_1 = arith.constant 0 : i32
    return %c0_i32, %c0_i32_0 : i32, i32
  }
  func.func @transform_12(%arg0: i32) -> (i32, i32) {
    %c0_i32 = arith.constant 0 : i32
    %c0_i32_0 = arith.constant 0 : i32
    %c0_i32_1 = arith.constant 0 : i32
    return %c0_i32, %c0_i32_0 : i32, i32
  }
  func.func @transform_13(%arg0: i32) -> (i32, i32) {
    %c0_i32 = arith.constant 0 : i32
    %c0_i32_0 = arith.constant 0 : i32
    return %arg0, %c0_i32 : i32, i32
  }
}

</mosaic_0001>

<bundles_post_ra>
// kernel: causal_batle_forward.1
= control target key start
LH: loop header
LB: loop body
LE: loop exit
PB: predicated region body
PF: predicated region fallthrough
CT: control target
= control target key end

     0   :  { %18 = vsyncpa [#allocation3], 0  ;;  %s3194_s0 = inlined_call_operand.vmem [shape: f32[8,128], index: 0, kind: input, shape index: {}]   ;;  %s3195_s1 = inlined_call_operand.hbm [shape: f32[128,128], index: 1, kind: input, shape index: {}]   ;;  %s3196_s2 = inlined_call_operand.vmem [shape: f32[1,128], index: 2, kind: input, shape index: {}]   ;;  %s3197_s3 = inlined_call_operand.hbm [shape: f32[128,128], index: 3, kind: input, shape index: {}]   ;;  %s3198_s4 = inlined_call_operand.vmem [shape: f32[1,128], index: 4, kind: input, shape index: {}]   ;;  %s3199_s5 = inlined_call_operand.hbm [shape: f32[128,128], index: 5, kind: input, shape index: {}]   ;;  %s3200_s6 = inlined_call_operand.vmem [shape: f32[1,128], index: 6, kind: input, shape index: {}]   ;;  %s3201_s7 = inlined_call_operand.hbm [shape: f32[128,640], index: 7, kind: input, shape index: {}]   ;;  %s3202_s8 = inlined_call_operand.vmem [shape: f32[1,640], index: 8, kind: input, shape index: {}]   ;;  %s3203_s9 = inlined_call_operand.hbm [shape: f32[512,512], index: 9, kind: input, shape index: {}]   ;;  %s3204_s10 = inlined_call_operand.vmem [shape: f32[1,512], index: 10, kind: input, shape index: {}]   ;;  %s3205_s11 = inlined_call_operand.hbm [shape: f32[384,384], index: 11, kind: input, shape index: {}]   ;;  %s3206_s12 = inlined_call_operand.vmem [shape: f32[1,384], index: 12, kind: input, shape index: {}]   ;;  %s3207_s13 = inlined_call_operand.vmem [shape: f32[8,640], index: 13, kind: output, shape index: {}]  }
   0x1   :  { %19 = vsyncpa [#allocation5], 0 }
   0x2   :  { %20 = vsyncpa [#allocation8], 0 }
   0x3   :  { %21 = vsyncpa [#allocation11], 0  ;;  %s2872_s25 = smov [#allocation4]   ;;  %s2873_s27 = smov [#allocation7]  }
   0x4   :  { %s43_s26 = sshll.u32 %s2872_s25, 4  ;;  %s71_s28 = sshll.u32 %s2873_s27, 4  ;;  %s44_s26 = int_to_ptr.vmem [resolvable:$true] %s43_s26  ;;  %s2959_s28 = int_to_ptr.vmem [resolvable:$true] %s71_s28 }
   0x5   :  { %s2732_s14 = scalar_lea.hbm %s3197_s3, 2048 }
   0x6   :  { %p2733_p0 = scmp.ne.s32.totalorder %s3197_s3, %s2732_s14  ;;  %p2736_p1 = scmp.lt.u32.totalorder %s2732_s14, %s3197_s3 }
   0x8   :  { %p2738_p2 = pnand %p2736_p1, %p2733_p0 }
   0xa   :  { %2741 = shalt.err (!%p2738_p2)
}
   0xb   :  { %s2742_s19 = scalar_lea.vmem %s44_s26, 2048  ;;  %p2747_p4 = scmp.lt.s32.totalorder %s44_s26, %s44_s26 }
   0xc   :  { %p2743_p3 = scmp.ne.s32.totalorder %s44_s26, %s2742_s19  ;;  %p2748_p5 = scmp.lt.s32.totalorder %s2742_s19, %s2742_s19 }
   0xe   :  { %p2749_p6 = por %p2748_p5, %p2747_p4 }
  0x10   :  { %p2750_p7 = pnand %p2749_p6, %p2743_p3 }
  0x12   :  { %2753 = shalt.err (!%p2750_p7)
}
  0x13   :  { %s2874_s20 = smov 128   ;;  %s2875_s21 = smov 8  }
  0x14   :  { %49 = dma.hbm_to_vmem [thread:$0]  %s3197_s3, 2048, %s44_s26, [#allocation5], %s2874_s20, %s2874_s20, %s2875_s21  }
  0x15   :  { %s2754_s27 = scalar_lea.hbm %s3201_s7, 10240 }
  0x16   :  { %p2755_p8 = scmp.ne.s32.totalorder %s3201_s7, %s2754_s27  ;;  %p2758_p9 = scmp.lt.u32.totalorder %s2754_s27, %s3201_s7 }
  0x18   :  { %p2760_p10 = pnand %p2758_p9, %p2755_p8 }
  0x1a   :  { %2763 = shalt.err (!%p2760_p10)
}
  0x1b   :  { %s2764_s16 = scalar_lea.vmem %s2959_s28, 10240  ;;  %p2769_p12 = scmp.lt.s32.totalorder %s2959_s28, %s2959_s28 }
  0x1c   :  { %p2765_p11 = scmp.ne.s32.totalorder %s2959_s28, %s2764_s16  ;;  %p2770_p13 = scmp.lt.s32.totalorder %s2764_s16, %s2764_s16 }
  0x1e   :  { %p2771_p0 = por %p2770_p13, %p2769_p12 }
  0x20   :  { %p2772_p1 = pnand %p2771_p0, %p2765_p11 }
  0x22   :  { %2775 = shalt.err (!%p2772_p1)
}
  0x23   :  { %s2876_s3 = smov 640   ;;  %s2877_s26 = smov 40  }
  0x24   :  { %77 = dma.hbm_to_vmem [thread:$0]  %s3201_s7, 10240, %s2959_s28, [#allocation8], %s2876_s3, %s2876_s3, %s2877_s26  }
  0x25   :  { %s2878_s19 = smov [#allocation2]   ;;  %s2879_s23 = smov [#allocation6]  }
  0x26   :  { %s29_s22 = sshll.u32 %s2878_s19, 4  ;;  %s57_s24 = sshll.u32 %s2879_s23, 4  ;;  %s30_s22 = int_to_ptr.vmem [resolvable:$true] %s29_s22  ;;  %s2993_s24 = int_to_ptr.vmem [resolvable:$true] %s57_s24 }
  0x27   :  { %s2776_s29 = scalar_lea.hbm %s3195_s1, 2048 }
  0x28   :  { %p2777_p2 = scmp.ne.s32.totalorder %s3195_s1, %s2776_s29  ;;  %p2780_p3 = scmp.lt.u32.totalorder %s2776_s29, %s3195_s1 }
  0x2a   :  { %p2782_p4 = pnand %p2780_p3, %p2777_p2 }
  0x2c   :  { %2785 = shalt.err (!%p2782_p4)
}
  0x2d   :  { %s2786_s7 = scalar_lea.vmem %s30_s22, 2048  ;;  %p2791_p6 = scmp.lt.s32.totalorder %s30_s22, %s30_s22 }
  0x2e   :  { %p2787_p5 = scmp.ne.s32.totalorder %s30_s22, %s2786_s7  ;;  %p2792_p7 = scmp.lt.s32.totalorder %s2786_s7, %s2786_s7 }
  0x30   :  { %p2793_p8 = por %p2792_p7, %p2791_p6 }
  0x32   :  { %p2794_p9 = pnand %p2793_p8, %p2787_p5 }
  0x34   :  { %2797 = shalt.err (!%p2794_p9)
}
  0x35   :  { %35 = dma.hbm_to_vmem [thread:$0]  %s3195_s1, 2048, %s30_s22, [#allocation3], %s2874_s20, %s2874_s20, %s2875_s21  }
  0x36   :  { %s2798_s18 = scalar_lea.hbm %s3199_s5, 2048 }
  0x37   :  { %p2799_p10 = scmp.ne.s32.totalorder %s3199_s5, %s2798_s18  ;;  %p2802_p11 = scmp.lt.u32.totalorder %s2798_s18, %s3199_s5 }
  0x39   :  { %p2804_p12 = pnand %p2802_p11, %p2799_p10 }
  0x3b   :  { %2807 = shalt.err (!%p2804_p12)
}
  0x3c   :  { %s2808_s29 = scalar_lea.vmem %s2993_s24, 2048  ;;  %p2813_p0 = scmp.lt.s32.totalorder %s2993_s24, %s2993_s24 }
  0x3d   :  { %p2809_p13 = scmp.ne.s32.totalorder %s2993_s24, %s2808_s29  ;;  %p2814_p1 = scmp.lt.s32.totalorder %s2808_s29, %s2808_s29 }
  0x3f   :  { %p2815_p2 = por %p2814_p1, %p2813_p0 }
  0x41   :  { %p2816_p3 = pnand %p2815_p2, %p2809_p13 }
  0x43   :  { %2819 = shalt.err (!%p2816_p3)
}
  0x44   :  { %63 = dma.hbm_to_vmem [thread:$0]  %s3199_s5, 2048, %s2993_s24, [#allocation5], %s2874_s20, %s2874_s20, %s2875_s21  }
  0x45   :  { %s2880_s30 = smov [#allocation9]   ;;  %s2820_s7 = scalar_lea.hbm %s3203_s9, 32768 }
  0x46   :  { %s85_s14 = sshll.u32 %s2880_s30, 4  ;;  %p2821_p4 = scmp.ne.s32.totalorder %s3203_s9, %s2820_s7  ;;  %s86_s14 = int_to_ptr.vmem [resolvable:$true] %s85_s14 }
  0x47   :  { %p2824_p5 = scmp.lt.u32.totalorder %s2820_s7, %s3203_s9 }
  0x49   :  { %p2826_p6 = pnand %p2824_p5, %p2821_p4 }
  0x4b   :  { %2829 = shalt.err (!%p2826_p6)
}
  0x4c   :  { %s2830_s18 = scalar_lea.vmem %s86_s14, 32768  ;;  %p2835_p8 = scmp.lt.s32.totalorder %s86_s14, %s86_s14 }
  0x4d   :  { %p2831_p7 = scmp.ne.s32.totalorder %s86_s14, %s2830_s18  ;;  %p2836_p9 = scmp.lt.s32.totalorder %s2830_s18, %s2830_s18 }
  0x4f   :  { %p2837_p10 = por %p2836_p9, %p2835_p8 }
  0x51   :  { %p2838_p11 = pnand %p2837_p10, %p2831_p7 }
  0x53   :  { %2841 = shalt.err (!%p2838_p11)
}
  0x54   :  { %s2881_s5 = smov 512   ;;  %s2882_s20 = smov 32  }
  0x55   :  { %91 = dma.hbm_to_vmem [thread:$0]  %s3203_s9, 32768, %s86_s14, [#allocation8], %s2881_s5, %s2881_s5, %s2882_s20  }
  0x56   :  { %s2883_s19 = smov [#allocation10]   ;;  %s2842_s29 = scalar_lea.hbm %s3205_s11, 18432 }
  0x57   :  { %s99_s23 = sshll.u32 %s2883_s19, 4  ;;  %p2843_p12 = scmp.ne.s32.totalorder %s3205_s11, %s2842_s29  ;;  %s100_s23 = int_to_ptr.vmem [resolvable:$true] %s99_s23 }
  0x58   :  { %p2846_p13 = scmp.lt.u32.totalorder %s2842_s29, %s3205_s11 }
  0x5a   :  { %p2848_p0 = pnand %p2846_p13, %p2843_p12 }
  0x5c   :  { %2851 = shalt.err (!%p2848_p0)
}
  0x5d   :  { %s2852_s16 = scalar_lea.vmem %s100_s23, 18432  ;;  %p2857_p2 = scmp.lt.s32.totalorder %s100_s23, %s100_s23 }
  0x5e   :  { %p2853_p1 = scmp.ne.s32.totalorder %s100_s23, %s2852_s16  ;;  %p2858_p3 = scmp.lt.s32.totalorder %s2852_s16, %s2852_s16 }
  0x60   :  { %p2859_p4 = por %p2858_p3, %p2857_p2 }
  0x62   :  { %p2860_p5 = pnand %p2859_p4, %p2853_p1 }
  0x64   :  { %2863 = shalt.err (!%p2860_p5)
}
  0x65   :  { %s2884_s9 = smov 384   ;;  %s2885_s14 = smov 24  }
  0x66   :  { %105 = dma.hbm_to_vmem [thread:$0]  %s3205_s11, 18432, %s100_s23, [#allocation11], %s2884_s9, %s2884_s9, %s2885_s14  }
  0x67   :  { %2864 = dma.done.wait [#allocation3], 2048  }
  0x68   :  { %2865 = vsyncadd [#allocation3], 4294965248 }
  0x69   :  { %2866 = dma.done.wait [#allocation5], 4096  }
  0x6a   :  { %2867 = vsyncadd [#allocation5], 4294963200 }
  0x6b   :  { %2868 = dma.done.wait [#allocation8], 43008  }
  0x6c   :  { %2869 = vsyncadd [#allocation8], 4294924288 }
  0x6d   :  { %2870 = dma.done.wait [#allocation11], 18432  }
  0x6e   :  { %2871 = vsyncadd [#allocation11], 4294948864  ;;  %v2886_v0 = vmov 0.0|0.0   ;;  %vm2887_vm0 = vmmov 0   ;;  %v2888_v1 = vmov 0.0   ;;  %v127_v2 = vld [vmem:[#allocation2] sm:$0xff] }
  0x6f   :  { %2113 = vmatprep.subr.bf16.mxu0 %v2886_v0  ;;  %1970 = vmatprep.mubr.msk.f32.mxu0 %vm2887_vm0, %v2888_v1  ;;  %v128_v3 = vld [vmem:[#allocation2 + $0x8] sm:$0xff]  ;;  %v129_v4 = vld [vmem:[#allocation2 + $0x10] sm:$0xff]  ;;  %v130_v6 = vld [vmem:[#allocation2 + $0x18] sm:$0xff] }
  0x70   :  { %2137 = vmatprep.subr.bf16.mxu1 %v2886_v0  ;;  %2005 = vmatprep.mubr.msk.f32.mxu1 %vm2887_vm0, %v2888_v1  ;;  %v2114_v5 = vpack.c.bf16 %v128_v3, %v127_v2  ;;  %v2117_v7 = vpack.c.bf16 %v130_v6, %v129_v4  ;;  %v131_v8 = vld [vmem:[#allocation2 + $0x20] sm:$0xff]  ;;  %v132_v9 = vld [vmem:[#allocation2 + $0x28] sm:$0xff]  ;;  %v228_v12 = vld [vmem:[#allocation4 + $0x10] sm:$0xff] }
  0x71   :  { %v226_v10 = vld [vmem:[#allocation4] sm:$0xff]  ;;  %v227_v11 = vld [vmem:[#allocation4 + $0x8] sm:$0xff]  ;;  %v229_v13 = vld [vmem:[#allocation4 + $0x18] sm:$0xff]  ;;  %v2120_v14 = vpack.c.bf16 %v132_v9, %v131_v8 }
  0x72   :  { %2115 = vmatpush3.bf16.msra.mxu0 %v2114_v5  ;;  %v2138_v15 = vpack.c.bf16 %v227_v11, %v226_v10  ;;  %v133_v16 = vld [vmem:[#allocation2 + $0x30] sm:$0xff]  ;;  %v134_v17 = vld [vmem:[#allocation2 + $0x38] sm:$0xff]  ;;  %v2141_v18 = vpack.c.bf16 %v229_v13, %v228_v12  ;;  %v230_v19 = vld [vmem:[#allocation4 + $0x20] sm:$0xff] }
  0x73   :  { %2116 = vmatprep.subr.bf16.mxu0 %v2886_v0  ;;  %v231_v20 = vld [vmem:[#allocation4 + $0x28] sm:$0xff]  ;;  %v2123_v21 = vpack.c.bf16 %v134_v17, %v133_v16  ;;  %v135_v22 = vld [vmem:[#allocation2 + $0x40] sm:$0xff]  ;;  %v137_v26 = vld [vmem:[#allocation2 + $0x50] sm:$0xff] }
  0x74   :  { %2139 = vmatpush3.bf16.msra.mxu1 %v2138_v15  ;;  %v136_v23 = vld [vmem:[#allocation2 + $0x48] sm:$0xff]  ;;  %v2144_v24 = vpack.c.bf16 %v231_v20, %v230_v19  ;;  %v138_v27 = vld [vmem:[#allocation2 + $0x58] sm:$0xff]  ;;  %v139_v29 = vld [vmem:[#allocation2 + $0x60] sm:$0xff] }
  0x75   :  { %2140 = vmatprep.subr.bf16.mxu1 %v2886_v0  ;;  %v2126_v25 = vpack.c.bf16 %v136_v23, %v135_v22  ;;  %v2129_v28 = vpack.c.bf16 %v138_v27, %v137_v26  ;;  %v140_v30 = vld [vmem:[#allocation2 + $0x68] sm:$0xff]  ;;  %v141_v32 = vld [vmem:[#allocation2 + $0x70] sm:$0xff]  ;;  %v142_v33 = vld [vmem:[#allocation2 + $0x78] sm:$0xff] }
  0x76   :  { %2118 = vmatpush3.bf16.msra.mxu0 %v2117_v7  ;;  %v2132_v31 = vpack.c.bf16 %v140_v30, %v139_v29  ;;  %v2135_v34 = vpack.c.bf16 %v142_v33, %v141_v32  ;;  %v126_v35 = vld [vmem:[%s3194_s0] sm:$0xff]  ;;  %v232_v36 = vld [vmem:[#allocation4 + $0x30] sm:$0xff]  ;;  %v233_v37 = vld [vmem:[#allocation4 + $0x38] sm:$0xff] }
  0x77   :  { %2119 = vmatprep.subr.bf16.mxu0 %v2886_v0  ;;  %v2147_v38 = vpack.c.bf16 %v233_v37, %v232_v36  ;;  %v234_v39 = vld [vmem:[#allocation4 + $0x40] sm:$0xff]  ;;  %v235_v40 = vld [vmem:[#allocation4 + $0x48] sm:$0xff]  ;;  %v236_v42 = vld [vmem:[#allocation4 + $0x50] sm:$0xff] }
  0x78   :  { %2142 = vmatpush3.bf16.msra.mxu1 %v2141_v18  ;;  %v2150_v41 = vpack.c.bf16 %v235_v40, %v234_v39  ;;  %v237_v43 = vld [vmem:[#allocation4 + $0x58] sm:$0xff]  ;;  %v238_v44 = vld [vmem:[#allocation4 + $0x60] sm:$0xff]  ;;  %v239_v46 = vld [vmem:[#allocation4 + $0x68] sm:$0xff] }
  0x79   :  { %2143 = vmatprep.subr.bf16.mxu1 %v2886_v0  ;;  %v2153_v45 = vpack.c.bf16 %v237_v43, %v236_v42  ;;  %v2156_v47 = vpack.c.bf16 %v239_v46, %v238_v44  ;;  %v240_v48 = vld [vmem:[#allocation4 + $0x70] sm:$0xff]  ;;  %v241_v49 = vld [vmem:[#allocation4 + $0x78] sm:$0xff]  ;;  %v325_v51 = vld [vmem:[#allocation6] sm:$0xff] }
  0x7a   :  { %2121 = vmatpush3.bf16.msra.mxu0 %v2120_v14  ;;  %v2159_v50 = vpack.c.bf16 %v241_v49, %v240_v48  ;;  %v326_v52 = vld [vmem:[#allocation6 + $0x8] sm:$0xff]  ;;  %v327_v53 = vld [vmem:[#allocation6 + $0x10] sm:$0xff]  ;;  %v328_v55 = vld [vmem:[#allocation6 + $0x18] sm:$0xff] }
  0x7b   :  { %2122 = vmatprep.subr.bf16.mxu0 %v2886_v0  ;;  %v2162_v54 = vpack.c.bf16 %v326_v52, %v325_v51  ;;  %v2165_v56 = vpack.c.bf16 %v328_v55, %v327_v53  ;;  %v329_v57 = vld [vmem:[#allocation6 + $0x20] sm:$0xff]  ;;  %v330_v58 = vld [vmem:[#allocation6 + $0x28] sm:$0xff]  ;;  %v331_v7 = vld [vmem:[#allocation6 + $0x30] sm:$0xff] }
  0x7c   :  { %2145 = vmatpush3.bf16.msra.mxu1 %v2144_v24  ;;  %v2168_v59 = vpack.c.bf16 %v330_v58, %v329_v57  ;;  %v1806_v60 = vld [vmem:[%s3196_s2] ss:$0 sm:$0xff]  ;;  %v332_v8 = vld [vmem:[#allocation6 + $0x38] sm:$0xff]  ;;  %v334_v11 = vld [vmem:[#allocation6 + $0x48] sm:$0xff] }
  0x7d   :  { %2146 = vmatprep.subr.bf16.mxu1 %v2886_v0  ;;  %v2171_v9 = vpack.c.bf16 %v332_v8, %v331_v7  ;;  %v333_v10 = vld [vmem:[#allocation6 + $0x40] sm:$0xff]  ;;  %v335_v13 = vld [vmem:[#allocation6 + $0x50] sm:$0xff]  ;;  %v336_v14 = vld [vmem:[#allocation6 + $0x58] sm:$0xff] }
  0x7e   :  { %2124 = vmatpush3.bf16.msra.mxu0 %v2123_v21  ;;  %v2174_v12 = vpack.c.bf16 %v334_v11, %v333_v10  ;;  %v337_v15 = vld [vmem:[#allocation6 + $0x60] sm:$0xff]  ;;  %v2177_v16 = vpack.c.bf16 %v336_v14, %v335_v13  ;;  %v338_v17 = vld [vmem:[#allocation6 + $0x68] sm:$0xff]  ;;  %v339_v19 = vld [vmem:[#allocation6 + $0x70] sm:$0xff] }
  0x7f   :  { %2125 = vmatprep.subr.bf16.mxu0 %v2886_v0  ;;  %v2180_v18 = vpack.c.bf16 %v338_v17, %v337_v15  ;;  %v340_v20 = vld [vmem:[#allocation6 + $0x78] sm:$0xff]  ;;  %v425_v22 = vld [vmem:[#allocation7 + $0x8] sm:$0xff]  ;;  %v430_v23 = vld [vmem:[#allocation7 + $0x30] sm:$0xff] }
  0x80   :  { %2148 = vmatpush3.bf16.msra.mxu1 %v2147_v38  ;;  %v2183_v21 = vpack.c.bf16 %v340_v20, %v339_v19  ;;  %v424_v24 = vld [vmem:[#allocation7] sm:$0xff]  ;;  %v429_v26 = vld [vmem:[#allocation7 + $0x28] sm:$0xff]  ;;  %v427_v27 = vld [vmem:[#allocation7 + $0x18] sm:$0xff] }
  0x81   :  { %2149 = vmatprep.subr.bf16.mxu1 %v2886_v0  ;;  %v2187_v29 = vpack.c.bf16 %v429_v26, %v424_v24  ;;  %v440_v32 = vld [vmem:[#allocation7 + $0x80] sm:$0xff]  ;;  %v434_v33 = vld [vmem:[#allocation7 + $0x50] sm:$0xff]  ;;  %v445_v37 = vld [vmem:[#allocation7 + $0xa8] sm:$0xff] }
  0x82   :  { %2127 = vmatpush3.bf16.msra.mxu0 %v2126_v25  ;;  %v2185_v25 = vpack.c.bf16 %v430_v23, %v425_v22  ;;  %v450_v38 = vld [vmem:[#allocation7 + $0xd0] sm:$0xff]  ;;  %v444_v40 = vld [vmem:[#allocation7 + $0xa0] sm:$0xff]  ;;  %v437_v51 = vld [vmem:[#allocation7 + $0x68] sm:$0xff] }
  0x83   :  { %2128 = vmatprep.subr.bf16.mxu0 %v2886_v0  ;;  %v2193_v39 = vpack.c.bf16 %v450_v38, %v445_v37  ;;  %v1808_v43 = vld [vmem:[%s3198_s4] ss:$0 sm:$0xff]  ;;  %v426_v49 = vld [vmem:[#allocation7 + $0x10] sm:$0xff]  ;;  %v441_v58 = vld [vmem:[#allocation7 + $0x88] sm:$0xff] }
  0x84   :  { %2151 = vmatpush3.bf16.msra.mxu1 %v2150_v41  ;;  %v449_v41 = vld [vmem:[#allocation7 + $0xc8] sm:$0xff]  ;;  %v442_v52 = vld [vmem:[#allocation7 + $0x90] sm:$0xff]  ;;  %v436_v57 = vld [vmem:[#allocation7 + $0x60] sm:$0xff] }
  0x85   :  { %2152 = vmatprep.subr.bf16.mxu1 %v2886_v0  ;;  %v2195_v42 = vpack.c.bf16 %v449_v41, %v444_v40  ;;  %v454_v8 = vld [vmem:[#allocation7 + $0xf0] sm:$0xff]  ;;  %v457_v10 = vld [vmem:[#allocation7 + $0x108] sm:$0xff]  ;;  %v456_v13 = vld [vmem:[#allocation7 + $0x100] sm:$0xff] }
  0x86   :  { %2130 = vmatpush3.bf16.msra.mxu0 %v2129_v28  ;;  %v432_v28 = vld [vmem:[#allocation7 + $0x40] sm:$0xff]  ;;  %v461_v14 = vld [vmem:[#allocation7 + $0x128] sm:$0xff]  ;;  %v467_v22 = vld [vmem:[#allocation7 + $0x158] sm:$0xff] }
  0x87   :  { %2131 = vmatprep.subr.bf16.mxu0 %v2886_v0  ;;  %v2217_v30 = vpack.c.bf16 %v432_v28, %v427_v27  ;;  %v465_v17 = vld [vmem:[#allocation7 + $0x148] sm:$0xff]  ;;  %v464_v20 = vld [vmem:[#allocation7 + $0x140] sm:$0xff]  ;;  %v471_v26 = vld [vmem:[#allocation7 + $0x178] sm:$0xff] }
  0x88   :  { %2154 = vmatpush3.bf16.msra.mxu1 %v2153_v45  ;;  %v472_v24 = vld [vmem:[#allocation7 + $0x180] sm:$0xff]  ;;  %v481_v38 = vld [vmem:[#allocation7 + $0x1c8] sm:$0xff] }
  0x89   :  { %2155 = vmatprep.subr.bf16.mxu1 %v2886_v0  ;;  %v2233_v27 = vpack.c.bf16 %v472_v24, %v467_v22  ;;  %v476_v37 = vld [vmem:[#allocation7 + $0x1a0] sm:$0xff]  ;;  %v485_v41 = vld [vmem:[#allocation7 + $0x1e8] sm:$0xff]  ;;  %v443_v22 = vld [vmem:[#allocation7 + $0x98] sm:$0xff] }
  0x8a   :  { %2133 = vmatpush3.bf16.msra.mxu0 %v2132_v31  ;;  %v435_v31 = vld [vmem:[#allocation7 + $0x58] sm:$0xff]  ;;  %v2239_v40 = vpack.c.bf16 %v481_v38, %v476_v37  ;;  %v788_v37 = vld [vmem:[#allocation9 + $0xc8] sm:$0xff] }
  0x8b   :  { %2134 = vmatprep.subr.bf16.mxu0 %v2886_v0  ;;  %v792_v38 = vld [vmem:[#allocation9 + $0xe8] sm:$0xff] }
  0x8c   :  { %2157 = vmatpush3.bf16.msra.mxu1 %v2156_v47 }
  0x8d   :  { %2158 = vmatprep.subr.bf16.mxu1 %v2886_v0 }
  0x8e   :  { %2136 = vmatpush3.bf16.msra.mxu0 %v2135_v34  ;;  %v439_v34 = vld [vmem:[#allocation7 + $0x78] sm:$0xff] }
  0x8f   :  { %2161 = vmatprep.subr.bf16.mxu0 %v2886_v0  ;;  %v2191_v36 = vpack.c.bf16 %v439_v34, %v434_v33  ;;  %v479_v33 = vld [vmem:[#allocation7 + $0x1b8] sm:$0xff]  ;;  %v477_v34 = vld [vmem:[#allocation7 + $0x1a8] sm:$0xff] }
  0x90   :  { %2160 = vmatpush3.bf16.msra.mxu1 %v2159_v50  ;;  %v431_v50 = vld [vmem:[#allocation7 + $0x38] sm:$0xff] }
  0x91   :  { %1971 = vmatmul.mubr.f32.vlgmr.msra.gmra.mrb[0].mxu0 %v126_v35  ;;  %2186 = vmatprep.subr.bf16.mxu1 %v2185_v25  ;;  %v2189_v35 = vpack.c.bf16 %v440_v32, %v435_v31  ;;  %v2219_v55 = vpack.c.bf16 %v431_v50, %v426_v49  ;;  %v466_v25 = vld [vmem:[#allocation7 + $0x150] sm:$0xff] }
  0x92   :  { %2040 = vmatprep.mubr.msk.f32.mxu0 %vm2887_vm0, %v2888_v1  ;;  %2163 = vmatpush3.bf16.msra.mxu0 %v2162_v54  ;;  %v2235_v28 = vpack.c.bf16 %v471_v26, %v466_v25  ;;  %v474_v32 = vld [vmem:[#allocation7 + $0x190] sm:$0xff]  ;;  %v771_v26 = vld [vmem:[#allocation9 + $0x40] sm:$0xff] }
  0x93   :  { %2164 = vmatprep.subr.bf16.mxu0 %v2886_v0  ;;  %v486_v50 = vld [vmem:[#allocation7 + $0x1f0] sm:$0xff] }
  0x96   :  { %2166 = vmatpush3.bf16.msra.mxu0 %v2165_v56  ;;  %v2221_v56 = vpack.c.bf16 %v442_v52, %v437_v51  ;;  %v491_v51 = vld [vmem:[#allocation7 + $0x218] sm:$0xff] }
  0x97   :  { %2167 = vmatprep.subr.bf16.mxu0 %v2886_v0  ;;  %v495_v52 = vld [vmem:[#allocation7 + $0x238] sm:$0xff] }
  0x9a   :  { %2169 = vmatpush3.bf16.msra.mxu0 %v2168_v59 }
  0x9b   :  { %2170 = vmatprep.subr.bf16.mxu0 %v2886_v0 }
  0x9e   :  { %2172 = vmatpush3.bf16.msra.mxu0 %v2171_v9  ;;  %v459_v9 = vld [vmem:[#allocation7 + $0x118] sm:$0xff] }
  0x9f   :  { %2173 = vmatprep.subr.bf16.mxu0 %v2886_v0  ;;  %v2199_v11 = vpack.c.bf16 %v459_v9, %v454_v8 }
  0xa2   :  { %2175 = vmatpush3.bf16.msra.mxu0 %v2174_v12  ;;  %v462_v12 = vld [vmem:[#allocation7 + $0x130] sm:$0xff] }
  0xa3   :  { %2176 = vmatprep.subr.bf16.mxu0 %v2886_v0  ;;  %v2229_v15 = vpack.c.bf16 %v462_v12, %v457_v10  ;;  %v428_v12 = vld [vmem:[#allocation7 + $0x20] sm:$0xff] }
  0xa6   :  { %2178 = vmatpush3.bf16.msra.mxu0 %v2177_v16  ;;  %v2231_v16 = vpack.c.bf16 %v461_v14, %v456_v13  ;;  %v433_v13 = vld [vmem:[#allocation7 + $0x48] sm:$0xff]  ;;  %v763_v14 = vld [vmem:[#allocation9] sm:$0xff] }
  0xa7   :  { %2179 = vmatprep.subr.bf16.mxu0 %v2886_v0 }
  0xaa   :  { %2181 = vmatpush3.bf16.msra.mxu0 %v2180_v18  ;;  %v470_v18 = vld [vmem:[#allocation7 + $0x170] sm:$0xff] }
  0xab   :  { %2182 = vmatprep.subr.bf16.mxu0 %v2886_v0  ;;  %v2201_v19 = vpack.c.bf16 %v470_v18, %v465_v17  ;;  %v772_v17 = vld [vmem:[#allocation9 + $0x48] sm:$0xff] }
  0xac   :  { %v776_v18 = vld [vmem:[#allocation9 + $0x68] sm:$0xff] }
  0xad   :  { %v2277_v25 = vpack.c.bf16 %v776_v18, %v772_v17  ;;  %v770_v18 = vld [vmem:[#allocation9 + $0x38] sm:$0xff] }
  0xae   :  { %2184 = vmatpush3.bf16.msra.mxu0 %v2183_v21  ;;  %v469_v21 = vld [vmem:[#allocation7 + $0x168] sm:$0xff] }
  0xaf   :  { %2218 = vmatprep.subr.bf16.mxu0 %v2217_v30  ;;  %v2203_v23 = vpack.c.bf16 %v469_v21, %v464_v20  ;;  %v480_v30 = vld [vmem:[#allocation7 + $0x1c0] sm:$0xff]  ;;  %v2250_v20 = vpack.c.bf16 %v433_v13, %v428_v12  ;;  %v438_v21 = vld [vmem:[#allocation7 + $0x70] sm:$0xff]  ;;  %v824_v12 = vld [vmem:[#allocation9 + $0x1e8] sm:$0xff] }
 0x164   :  { %v216_v61 = vpop.f32.mrb[0].mxu0 }
 0x165   :  { %v217_v62 = vadd.f32 %v1806_v60, %v216_v61  ;;  %v1972_v63 = vpop.f32.mrb[1].mxu0  ;;  %v447_v60 = vld [vmem:[#allocation7 + $0xb8] sm:$0xff]  ;;  %v452_v61 = vld [vmem:[#allocation7 + $0xe0] sm:$0xff] }
 0x166   :  { %v2225_v63 = vpack.c.bf16 %v452_v61, %v447_v60  ;;  %v496_v60 = vld [vmem:[#allocation7 + $0x240] sm:$0xff] }
 0x167   :  { %v221_v2 = vmin.f32 %v217_v62, 0.0  ;;  %vm220_vm1 = vcmp.gt.f32.partialorder %v217_v62, 0.0 }
 0x169   :  { %v222_v3 = vmul.f32 1.442695, %v221_v2  ;;  %v446_v2 = vld [vmem:[#allocation7 + $0xb0] sm:$0xff] }
 0x16b   :  { %2710 = vpow2.f32 %v222_v3  ;;  %v451_v3 = vld [vmem:[#allocation7 + $0xd8] sm:$0xff] }
 0x175   :  { %v2711_v4 = vpop.eup %2710 }
 0x176   :  { %v1807_v5 = vadd.f32 -1.0, %v2711_v4  ;;  %v2227_v4 = vpack.c.bf16 %v451_v3, %v446_v2  ;;  %v764_v3 = vld [vmem:[#allocation9 + $0x8] sm:$0xff] }
 0x178   :  { %v225_v6 = vsel %vm220_vm1, %v217_v62, %v1807_v5  ;;  %v2223_v62 = vpack.c.bf16 %v441_v58, %v436_v57  ;;  %v455_v5 = vld [vmem:[#allocation7 + $0xf8] sm:$0xff]  ;;  %v497_v58 = vld [vmem:[#allocation7 + $0x248] sm:$0xff] }
 0x179   :  { %2006 = vmatmul.mubr.f32.vlgmr.msra.gmra.mrb[0].mxu1 %v225_v6  ;;  %v460_v6 = vld [vmem:[#allocation7 + $0x120] sm:$0xff] }
 0x17a   :  { %595 = vmatprep.mubr.f32.mxu1 %v2888_v1  ;;  %2188 = vmatpush1.bf16.msra.mxu1 %v2187_v29  ;;  %v2197_v7 = vpack.c.bf16 %v460_v6, %v455_v5  ;;  %v475_v29 = vld [vmem:[#allocation7 + $0x198] sm:$0xff]  ;;  %v1810_v6 = vld [vmem:[%s3200_s6] ss:$0 sm:$0xff] }
 0x17b   :  { %2190 = vmatprep.subr.bf16.mxu1 %v2189_v35  ;;  %v2205_v31 = vpack.c.bf16 %v480_v30, %v475_v29  ;;  %v2207_v35 = vpack.c.bf16 %v479_v33, %v474_v32  ;;  %v784_v29 = vld [vmem:[#allocation9 + $0xa8] sm:$0xff]  ;;  %v2253_v30 = vpack.c.bf16 %v443_v22, %v438_v21  ;;  %v823_v21 = vld [vmem:[#allocation9 + $0x1e0] sm:$0xff] }
 0x17c   :  { %v453_v32 = vld [vmem:[#allocation7 + $0xe8] sm:$0xff] }
 0x17d   :  { %v828_v22 = vld [vmem:[#allocation9 + $0x208] sm:$0xff] }
 0x17e   :  { %2192 = vmatpush1.bf16.msra.mxu1 %v2191_v36  ;;  %v482_v36 = vld [vmem:[#allocation7 + $0x1d0] sm:$0xff] }
 0x17f   :  { %2194 = vmatprep.subr.bf16.mxu1 %v2193_v39  ;;  %v2237_v39 = vpack.c.bf16 %v482_v36, %v477_v34  ;;  %v783_v36 = vld [vmem:[#allocation9 + $0xa0] sm:$0xff] }
 0x182   :  { %2196 = vmatpush1.bf16.msra.mxu1 %v2195_v42  ;;  %v490_v42 = vld [vmem:[#allocation7 + $0x210] sm:$0xff] }
 0x183   :  { %2198 = vmatprep.subr.bf16.mxu1 %v2197_v7 }
 0x186   :  { %2200 = vmatpush1.bf16.msra.mxu1 %v2199_v11 }
 0x187   :  { %2202 = vmatprep.subr.bf16.mxu1 %v2201_v19 }
 0x18a   :  { %2204 = vmatpush1.bf16.msra.mxu1 %v2203_v23 }
 0x18b   :  { %2206 = vmatprep.subr.bf16.mxu1 %v2205_v31  ;;  %v448_v31 = vld [vmem:[#allocation7 + $0xc0] sm:$0xff] }
 0x18e   :  { %2208 = vmatpush1.bf16.msra.mxu1 %v2207_v35  ;;  %v779_v35 = vld [vmem:[#allocation9 + $0x80] sm:$0xff] }
 0x24c   :  { %v315_v44 = vpop.f32.mrb[0].mxu1 }
 0x24d   :  { %v316_v45 = vadd.f32 %v1808_v43, %v315_v44  ;;  %v2007_v46 = vpop.f32.mrb[1].mxu1  ;;  %v484_v43 = vld [vmem:[#allocation7 + $0x1e0] sm:$0xff]  ;;  %v2209_v44 = vpack.c.bf16 %v490_v42, %v485_v41  ;;  %v463_v41 = vld [vmem:[#allocation7 + $0x138] sm:$0xff]  ;;  %v2283_v42 = vpack.c.bf16 %v783_v36, %v779_v35  ;;  %v836_v35 = vld [vmem:[#allocation9 + $0x248] sm:$0xff] }
 0x24e   :  { %v487_v46 = vld [vmem:[#allocation7 + $0x1f8] sm:$0xff]  ;;  %v840_v36 = vld [vmem:[#allocation9 + $0x268] sm:$0xff] }
 0x24f   :  { %v320_v47 = vmin.f32 %v316_v45, 0.0  ;;  %vm319_vm2 = vcmp.gt.f32.partialorder %v316_v45, 0.0  ;;  %2210 = vmatprep.subr.bf16.mxu1 %v2209_v44  ;;  %v787_v44 = vld [vmem:[#allocation9 + $0xc0] sm:$0xff] }
 0x251   :  { %v321_v48 = vmul.f32 1.442695, %v320_v47  ;;  %v492_v47 = vld [vmem:[#allocation7 + $0x220] sm:$0xff] }
 0x252   :  { %v2241_v49 = vpack.c.bf16 %v492_v47, %v487_v46  ;;  %v796_v46 = vld [vmem:[#allocation9 + $0x108] sm:$0xff] }
 0x253   :  { %2712 = vpow2.f32 %v321_v48  ;;  %v800_v47 = vld [vmem:[#allocation9 + $0x128] sm:$0xff] }
 0x25d   :  { %v2713_v53 = vpop.eup %2712 }
 0x25e   :  { %v1809_v54 = vadd.f32 -1.0, %v2713_v53  ;;  %v2243_v53 = vpack.c.bf16 %v491_v51, %v486_v50  ;;  %v473_v50 = vld [vmem:[#allocation7 + $0x188] sm:$0xff] }
 0x260   :  { %v324_v59 = vsel %vm319_vm2, %v316_v45, %v1809_v54  ;;  %v489_v45 = vld [vmem:[#allocation7 + $0x208] sm:$0xff]  ;;  %v500_v54 = vld [vmem:[#allocation7 + $0x260] sm:$0xff] }
 0x261   :  { %2041 = vmatmul.mubr.f32.vlgmr.msra.gmra.mrb[2].mxu0 %v324_v59  ;;  %v2211_v48 = vpack.c.bf16 %v489_v45, %v484_v43  ;;  %v2213_v57 = vpack.c.bf16 %v500_v54, %v495_v52  ;;  %v502_v59 = vld [vmem:[#allocation7 + $0x270] sm:$0xff]  ;;  %v2285_v43 = vpack.c.bf16 %v792_v38, %v788_v37  ;;  %v791_v45 = vld [vmem:[#allocation9 + $0xe0] sm:$0xff]  ;;  %v2289_v52 = vpack.c.bf16 %v800_v47, %v796_v46 }
 0x262   :  { %2220 = vmatpush1.bf16.msra.mxu0 %v2219_v55  ;;  %666 = vmatprep.mubr.f32.mxu0 %v2888_v1  ;;  %v494_v55 = vld [vmem:[#allocation7 + $0x230] sm:$0xff]  ;;  %v2287_v51 = vpack.c.bf16 %v791_v45, %v787_v44  ;;  %v799_v54 = vld [vmem:[#allocation9 + $0x120] sm:$0xff]  ;;  %v2309_v44 = vpack.c.bf16 %v840_v36, %v836_v35  ;;  %v846_v35 = vld [vmem:[#allocation9 + $0x298] sm:$0xff] }
 0x263   :  { %2222 = vmatprep.subr.bf16.mxu0 %v2221_v56  ;;  %v499_v56 = vld [vmem:[#allocation7 + $0x258] sm:$0xff]  ;;  %2212 = vmatpush1.bf16.msra.mxu1 %v2211_v48  ;;  %v835_v45 = vld [vmem:[#allocation9 + $0x240] sm:$0xff] }
 0x264   :  { %v2215_v61 = vpack.c.bf16 %v499_v56, %v494_v55  ;;  %2214 = vmatprep.subr.bf16.mxu1 %v2213_v57  ;;  %v804_v55 = vld [vmem:[#allocation9 + $0x148] sm:$0xff]  ;;  %v839_v46 = vld [vmem:[#allocation9 + $0x260] sm:$0xff] }
 0x265   :  { %v808_v56 = vld [vmem:[#allocation9 + $0x168] sm:$0xff] }
 0x266   :  { %2224 = vmatpush1.bf16.msra.mxu0 %v2223_v62  ;;  %v2245_v62 = vpack.c.bf16 %v502_v59, %v497_v58  ;;  %v478_v58 = vld [vmem:[#allocation7 + $0x1b0] sm:$0xff]  ;;  %v483_v59 = vld [vmem:[#allocation7 + $0x1d8] sm:$0xff] }
 0x267   :  { %2226 = vmatprep.subr.bf16.mxu0 %v2225_v63  ;;  %v501_v63 = vld [vmem:[#allocation7 + $0x268] sm:$0xff]  ;;  %2216 = vmatpush1.bf16.msra.mxu1 %v2215_v61  ;;  %v2293_v61 = vpack.c.bf16 %v808_v56, %v804_v55  ;;  %v789_v56 = vld [vmem:[#allocation9 + $0xd0] sm:$0xff] }
 0x268   :  { %v2247_v2 = vpack.c.bf16 %v501_v63, %v496_v60  ;;  %2249 = vmatprep.subr.bf16.mxu1 %v2886_v0  ;;  %v807_v63 = vld [vmem:[#allocation9 + $0x160] sm:$0xff] }
 0x26a   :  { %2228 = vmatpush1.bf16.msra.mxu0 %v2227_v4  ;;  %v768_v4 = vld [vmem:[#allocation9 + $0x28] sm:$0xff] }
 0x26b   :  { %2230 = vmatprep.subr.bf16.mxu0 %v2229_v15  ;;  %v2273_v5 = vpack.c.bf16 %v768_v4, %v764_v3  ;;  %v767_v15 = vld [vmem:[#allocation9 + $0x20] sm:$0xff]  ;;  %v816_v3 = vld [vmem:[#allocation9 + $0x1a8] sm:$0xff]  ;;  %v2265_v4 = vpack.c.bf16 %v483_v59, %v478_v58  ;;  %v798_v58 = vld [vmem:[#allocation9 + $0x118] sm:$0xff] }
 0x26c   :  { %v2275_v23 = vpack.c.bf16 %v767_v15, %v763_v14  ;;  %v498_v14 = vld [vmem:[#allocation7 + $0x250] sm:$0xff]  ;;  %v503_v15 = vld [vmem:[#allocation7 + $0x278] sm:$0xff] }
 0x26e   :  { %2232 = vmatpush1.bf16.msra.mxu0 %v2231_v16 }
 0x26f   :  { %2234 = vmatprep.subr.bf16.mxu0 %v2233_v27  ;;  %v775_v27 = vld [vmem:[#allocation9 + $0x60] sm:$0xff] }
 0x270   :  { %v2279_v33 = vpack.c.bf16 %v775_v27, %v771_v26  ;;  %v765_v27 = vld [vmem:[#allocation9 + $0x10] sm:$0xff] }
 0x272   :  { %2236 = vmatpush1.bf16.msra.mxu0 %v2235_v28  ;;  %v780_v28 = vld [vmem:[#allocation9 + $0x88] sm:$0xff] }
 0x273   :  { %2238 = vmatprep.subr.bf16.mxu0 %v2237_v39  ;;  %v2281_v34 = vpack.c.bf16 %v784_v29, %v780_v28  ;;  %v2256_v39 = vpack.c.bf16 %v453_v32, %v448_v31  ;;  %v769_v28 = vld [vmem:[#allocation9 + $0x30] sm:$0xff]  ;;  %v774_v29 = vld [vmem:[#allocation9 + $0x58] sm:$0xff] }
 0x274   :  { %v778_v31 = vld [vmem:[#allocation9 + $0x78] sm:$0xff]  ;;  %v2403_v37 = vpack.c.bf16 %v769_v28, %v765_v27 }
 0x275   :  { %v2405_v38 = vpack.c.bf16 %v778_v31, %v774_v29  ;;  %v842_v27 = vld [vmem:[#allocation9 + $0x278] sm:$0xff]  ;;  %v841_v31 = vld [vmem:[#allocation9 + $0x270] sm:$0xff] }
 0x276   :  { %2240 = vmatpush1.bf16.msra.mxu0 %v2239_v40  ;;  %v458_v40 = vld [vmem:[#allocation7 + $0x110] sm:$0xff] }
 0x277   :  { %2242 = vmatprep.subr.bf16.mxu0 %v2241_v49  ;;  %v2259_v48 = vpack.c.bf16 %v463_v41, %v458_v40  ;;  %v468_v49 = vld [vmem:[#allocation7 + $0x160] sm:$0xff]  ;;  %v777_v40 = vld [vmem:[#allocation9 + $0x70] sm:$0xff]  ;;  %v782_v41 = vld [vmem:[#allocation9 + $0x98] sm:$0xff] }
 0x278   :  { %v2262_v57 = vpack.c.bf16 %v473_v50, %v468_v49  ;;  %v781_v49 = vld [vmem:[#allocation9 + $0x90] sm:$0xff] }
 0x279   :  { %v785_v50 = vld [vmem:[#allocation9 + $0xb0] sm:$0xff] }
 0x27a   :  { %2244 = vmatpush1.bf16.msra.mxu0 %v2243_v53  ;;  %v795_v53 = vld [vmem:[#allocation9 + $0x100] sm:$0xff] }
 0x27b   :  { %2246 = vmatprep.subr.bf16.mxu0 %v2245_v62  ;;  %v2291_v60 = vpack.c.bf16 %v799_v54, %v795_v53  ;;  %v803_v62 = vld [vmem:[#allocation9 + $0x140] sm:$0xff]  ;;  %v794_v53 = vld [vmem:[#allocation9 + $0xf8] sm:$0xff]  ;;  %v2411_v54 = vpack.c.bf16 %v785_v50, %v781_v49 }
 0x27c   :  { %v858_v49 = vld [vmem:[#allocation9 + $0x2f8] sm:$0xff]  ;;  %v851_v50 = vld [vmem:[#allocation9 + $0x2c0] sm:$0xff] }
 0x27e   :  { %2248 = vmatpush1.bf16.msra.mxu0 %v2247_v2  ;;  %v812_v2 = vld [vmem:[#allocation9 + $0x188] sm:$0xff] }
 0x27f   :  { %2274 = vmatprep.subr.bf16.mxu0 %v2273_v5  ;;  %v488_v5 = vld [vmem:[#allocation7 + $0x200] sm:$0xff] }
 0x334   :  { %v414_v7 = vpop.f32.mrb[2].mxu0 }
 0x335   :  { %v415_v8 = vadd.f32 %v1810_v6, %v414_v7  ;;  %v2042_v9 = vpop.f32.mrb[3].mxu0  ;;  %v493_v6 = vld [vmem:[#allocation7 + $0x228] sm:$0xff]  ;;  %v2295_v7 = vpack.c.bf16 %v807_v63, %v803_v62  ;;  %v801_v62 = vld [vmem:[#allocation9 + $0x130] sm:$0xff]  ;;  %v806_v63 = vld [vmem:[#allocation9 + $0x158] sm:$0xff] }
 0x336   :  { %v811_v9 = vld [vmem:[#allocation9 + $0x180] sm:$0xff]  ;;  %v2268_v13 = vpack.c.bf16 %v493_v6, %v488_v5  ;;  %v805_v5 = vld [vmem:[#allocation9 + $0x150] sm:$0xff] }
 0x337   :  { %v419_v10 = vmin.f32 %v415_v8, 0.0  ;;  %vm418_vm3 = vcmp.gt.f32.partialorder %v415_v8, 0.0  ;;  %v809_v6 = vld [vmem:[#allocation9 + $0x170] sm:$0xff] }
 0x339   :  { %v420_v11 = vmul.f32 1.442695, %v419_v10  ;;  %v815_v10 = vld [vmem:[#allocation9 + $0x1a0] sm:$0xff] }
 0x33a   :  { %v2299_v17 = vpack.c.bf16 %v815_v10, %v811_v9  ;;  %v2423_v9 = vpack.c.bf16 %v809_v6, %v805_v5  ;;  %v868_v5 = vld [vmem:[#allocation9 + $0x348] sm:$0xff] }
 0x33b   :  { %2714 = vpow2.f32 %v420_v11  ;;  %v820_v11 = vld [vmem:[#allocation9 + $0x1c8] sm:$0xff] }
 0x345   :  { %v2715_v16 = vpop.eup %2714 }
 0x346   :  { %v1811_v19 = vadd.f32 -1.0, %v2715_v16  ;;  %v766_v16 = vld [vmem:[#allocation9 + $0x18] sm:$0xff] }
 0x347   :  { %v2401_v26 = vpack.c.bf16 %v770_v18, %v766_v16  ;;  %v825_v18 = vld [vmem:[#allocation9 + $0x1f0] sm:$0xff] }
 0x348   :  { %v3099_v24 = vsel %vm418_vm3, %v415_v8, %v1811_v19  ;;  %v2297_v8 = vpack.c.bf16 %v816_v3, %v812_v2  ;;  %v2301_v19 = vpack.c.bf16 %v824_v12, %v820_v11  ;;  %v810_v2 = vld [vmem:[#allocation9 + $0x178] sm:$0xff]  ;;  %v813_v11 = vld [vmem:[#allocation9 + $0x190] sm:$0xff] }
 0x349   :  { %596 = vmatmul.mubr.f32.vlgmr.msra.gmra.mrb[2].mxu1 %v3099_v24  ;;  %667 = vmatmul.mubr.f32.vlgmr.msra.gmra.mrb[4].mxu0 %v3099_v24  ;;  %v817_v12 = vld [vmem:[#allocation9 + $0x1b0] sm:$0xff] }
 0x34a   :  { %2251 = vmatpush3.bf16.msra.mxu1 %v2250_v20  ;;  %2075 = vmatprep.mubr.msk.f32.mxu1 %vm2887_vm0, %v2888_v1  ;;  %v819_v20 = vld [vmem:[#allocation9 + $0x1c0] sm:$0xff] }
 0x34b   :  { %2252 = vmatprep.subr.bf16.mxu1 %v2886_v0  ;;  %2276 = vmatpush1.bf16.msra.mxu0 %v2275_v23  ;;  %v832_v23 = vld [vmem:[#allocation9 + $0x228] sm:$0xff] }
 0x34c   :  { %2278 = vmatprep.subr.bf16.mxu0 %v2277_v25  ;;  %v2271_v25 = vpack.c.bf16 %v503_v15, %v498_v14  ;;  %v2305_v32 = vpack.c.bf16 %v832_v23, %v828_v22  ;;  %v826_v14 = vld [vmem:[#allocation9 + $0x1f8] sm:$0xff]  ;;  %v2427_v15 = vpack.c.bf16 %v817_v12, %v813_v11  ;;  %v829_v23 = vld [vmem:[#allocation9 + $0x210] sm:$0xff]  ;;  %v867_v12 = vld [vmem:[#allocation9 + $0x340] sm:$0xff] }
 0x34e   :  { %2254 = vmatpush3.bf16.msra.mxu1 %v2253_v30  ;;  %v2303_v30 = vpack.c.bf16 %v823_v21, %v819_v20  ;;  %v834_v20 = vld [vmem:[#allocation9 + $0x238] sm:$0xff] }
 0x34f   :  { %2255 = vmatprep.subr.bf16.mxu1 %v2886_v0  ;;  %2280 = vmatpush1.bf16.msra.mxu0 %v2279_v33  ;;  %v827_v33 = vld [vmem:[#allocation9 + $0x200] sm:$0xff] }
 0x350   :  { %2282 = vmatprep.subr.bf16.mxu0 %v2281_v34  ;;  %v831_v34 = vld [vmem:[#allocation9 + $0x220] sm:$0xff] }
 0x352   :  { %2257 = vmatpush3.bf16.msra.mxu1 %v2256_v39  ;;  %v773_v39 = vld [vmem:[#allocation9 + $0x50] sm:$0xff] }
 0x353   :  { %2258 = vmatprep.subr.bf16.mxu1 %v2886_v0  ;;  %2284 = vmatpush1.bf16.msra.mxu0 %v2283_v42  ;;  %v2307_v42 = vpack.c.bf16 %v831_v34, %v827_v33  ;;  %v2407_v47 = vpack.c.bf16 %v777_v40, %v773_v39  ;;  %v844_v33 = vld [vmem:[#allocation9 + $0x288] sm:$0xff]  ;;  %v847_v39 = vld [vmem:[#allocation9 + $0x2a0] sm:$0xff] }
 0x354   :  { %2286 = vmatprep.subr.bf16.mxu0 %v2285_v43  ;;  %v786_v43 = vld [vmem:[#allocation9 + $0xb8] sm:$0xff]  ;;  %v848_v34 = vld [vmem:[#allocation9 + $0x2a8] sm:$0xff] }
 0x355   :  { %v2313_v36 = vpack.c.bf16 %v848_v34, %v844_v33 }
 0x356   :  { %2260 = vmatpush3.bf16.msra.mxu1 %v2259_v48  ;;  %v2409_v48 = vpack.c.bf16 %v786_v43, %v782_v41  ;;  %v849_v43 = vld [vmem:[#allocation9 + $0x2b0] sm:$0xff] }
 0x357   :  { %2261 = vmatprep.subr.bf16.mxu1 %v2886_v0  ;;  %2288 = vmatpush1.bf16.msra.mxu0 %v2287_v51  ;;  %v2311_v51 = vpack.c.bf16 %v839_v46, %v835_v45  ;;  %v852_v45 = vld [vmem:[#allocation9 + $0x2c8] sm:$0xff] }
 0x358   :  { %2290 = vmatprep.subr.bf16.mxu0 %v2289_v52  ;;  %v790_v52 = vld [vmem:[#allocation9 + $0xd8] sm:$0xff]  ;;  %v856_v46 = vld [vmem:[#allocation9 + $0x2e8] sm:$0xff] }
 0x359   :  { %v2413_v55 = vpack.c.bf16 %v794_v53, %v790_v52 }
 0x35a   :  { %2263 = vmatpush3.bf16.msra.mxu1 %v2262_v57  ;;  %v793_v57 = vld [vmem:[#allocation9 + $0xf0] sm:$0xff] }
 0x35b   :  { %2264 = vmatprep.subr.bf16.mxu1 %v2886_v0  ;;  %2292 = vmatpush1.bf16.msra.mxu0 %v2291_v60  ;;  %v2415_v59 = vpack.c.bf16 %v793_v57, %v789_v56  ;;  %v860_v57 = vld [vmem:[#allocation9 + $0x308] sm:$0xff] }
 0x35c   :  { %2294 = vmatprep.subr.bf16.mxu0 %v2293_v61  ;;  %v797_v61 = vld [vmem:[#allocation9 + $0x110] sm:$0xff] }
 0x35d   :  { %v2419_v3 = vpack.c.bf16 %v801_v62, %v797_v61  ;;  %v859_v61 = vld [vmem:[#allocation9 + $0x300] sm:$0xff] }
 0x35e   :  { %2266 = vmatpush3.bf16.msra.mxu1 %v2265_v4  ;;  %v2421_v4 = vpack.c.bf16 %v810_v2, %v806_v63  ;;  %v863_v62 = vld [vmem:[#allocation9 + $0x320] sm:$0xff] }
 0x35f   :  { %2267 = vmatprep.subr.bf16.mxu1 %v2886_v0  ;;  %2296 = vmatpush1.bf16.msra.mxu0 %v2295_v7  ;;  %v814_v7 = vld [vmem:[#allocation9 + $0x198] sm:$0xff]  ;;  %v2323_v2 = vpack.c.bf16 %v863_v62, %v859_v61 }
 0x360   :  { %2298 = vmatprep.subr.bf16.mxu0 %v2297_v8  ;;  %v818_v8 = vld [vmem:[#allocation9 + $0x1b8] sm:$0xff] }
 0x361   :  { %v2425_v10 = vpack.c.bf16 %v818_v8, %v814_v7  ;;  %v872_v7 = vld [vmem:[#allocation9 + $0x368] sm:$0xff]  ;;  %v870_v8 = vld [vmem:[#allocation9 + $0x358] sm:$0xff] }
 0x362   :  { %2269 = vmatpush3.bf16.msra.mxu1 %v2268_v13  ;;  %v822_v13 = vld [vmem:[#allocation9 + $0x1d8] sm:$0xff] }
 0x363   :  { %2270 = vmatprep.subr.bf16.mxu1 %v2886_v0  ;;  %2300 = vmatpush1.bf16.msra.mxu0 %v2299_v17  ;;  %v2429_v16 = vpack.c.bf16 %v826_v14, %v822_v13  ;;  %v821_v17 = vld [vmem:[#allocation9 + $0x1d0] sm:$0xff]  ;;  %v871_v13 = vld [vmem:[#allocation9 + $0x360] sm:$0xff] }
 0x364   :  { %2302 = vmatprep.subr.bf16.mxu0 %v2301_v19  ;;  %v830_v19 = vld [vmem:[#allocation9 + $0x218] sm:$0xff]  ;;  %v2431_v21 = vpack.c.bf16 %v825_v18, %v821_v17  ;;  %v869_v14 = vld [vmem:[#allocation9 + $0x350] sm:$0xff]  ;;  %v876_v17 = vld [vmem:[#allocation9 + $0x388] sm:$0xff] }
 0x365   :  { %v2433_v22 = vpack.c.bf16 %v834_v20, %v830_v19  ;;  %v880_v18 = vld [vmem:[#allocation9 + $0x3a8] sm:$0xff] }
 0x366   :  { %2272 = vmatpush3.bf16.msra.mxu1 %v2271_v25  ;;  %v833_v25 = vld [vmem:[#allocation9 + $0x230] sm:$0xff]  ;;  %v2329_v20 = vpack.c.bf16 %v880_v18, %v876_v17  ;;  %v902_v17 = vld [vmem:[#allocation9 + $0x458] sm:$0xff] }
 0x367   :  { %2402 = vmatprep.subr.bf16.mxu1 %v2401_v26  ;;  %2304 = vmatpush1.bf16.msra.mxu0 %v2303_v30  ;;  %v838_v26 = vld [vmem:[#allocation9 + $0x258] sm:$0xff]  ;;  %v2435_v28 = vpack.c.bf16 %v833_v25, %v829_v23  ;;  %v837_v30 = vld [vmem:[#allocation9 + $0x250] sm:$0xff]  ;;  %v875_v23 = vld [vmem:[#allocation9 + $0x380] sm:$0xff] }
 0x368   :  { %2306 = vmatprep.subr.bf16.mxu0 %v2305_v32  ;;  %v2437_v29 = vpack.c.bf16 %v842_v27, %v838_v26  ;;  %v2439_v32 = vpack.c.bf16 %v841_v31, %v837_v30  ;;  %v879_v26 = vld [vmem:[#allocation9 + $0x3a0] sm:$0xff]  ;;  %v877_v27 = vld [vmem:[#allocation9 + $0x390] sm:$0xff]  ;;  %v884_v30 = vld [vmem:[#allocation9 + $0x3c8] sm:$0xff] }
 0x369   :  { %2076 = vmatmul.mubr.f32.vlgmr.msra.gmra.mrb[4].mxu1 %v3099_v24  ;;  %v802_v24 = vld [vmem:[#allocation9 + $0x138] sm:$0xff]  ;;  %v888_v31 = vld [vmem:[#allocation9 + $0x3e8] sm:$0xff] }
 0x36a   :  { %2404 = vmatpush1.bf16.msra.mxu1 %v2403_v37  ;;  %v2417_v60 = vpack.c.bf16 %v802_v24, %v798_v58  ;;  %v850_v37 = vld [vmem:[#allocation9 + $0x2b8] sm:$0xff]  ;;  %v864_v58 = vld [vmem:[#allocation9 + $0x328] sm:$0xff]  ;;  %v2333_v34 = vpack.c.bf16 %v888_v31, %v884_v30 }
 0x36b   :  { %2406 = vmatprep.subr.bf16.mxu1 %v2405_v38  ;;  %2308 = vmatpush1.bf16.msra.mxu0 %v2307_v42  ;;  %v843_v38 = vld [vmem:[#allocation9 + $0x280] sm:$0xff]  ;;  %v2441_v40 = vpack.c.bf16 %v850_v37, %v846_v35  ;;  %v845_v42 = vld [vmem:[#allocation9 + $0x290] sm:$0xff]  ;;  %v862_v24 = vld [vmem:[#allocation9 + $0x318] sm:$0xff] }
 0x36c   :  { %2310 = vmatprep.subr.bf16.mxu0 %v2309_v44  ;;  %v2315_v41 = vpack.c.bf16 %v847_v39, %v843_v38  ;;  %v2443_v44 = vpack.c.bf16 %v849_v43, %v845_v42  ;;  %v890_v35 = vld [vmem:[#allocation9 + $0x3f8] sm:$0xff]  ;;  %v887_v37 = vld [vmem:[#allocation9 + $0x3e0] sm:$0xff]  ;;  %v885_v39 = vld [vmem:[#allocation9 + $0x3d0] sm:$0xff] }
 0x36d   :  { %v892_v43 = vld [vmem:[#allocation9 + $0x408] sm:$0xff]  ;;  %v906_v18 = vld [vmem:[#allocation9 + $0x478] sm:$0xff] }
 0x36e   :  { %2408 = vmatpush1.bf16.msra.mxu1 %v2407_v47  ;;  %v854_v47 = vld [vmem:[#allocation9 + $0x2d8] sm:$0xff]  ;;  %v908_v30 = vld [vmem:[#allocation9 + $0x488] sm:$0xff] }
 0x36f   :  { %2410 = vmatprep.subr.bf16.mxu1 %v2409_v48  ;;  %2312 = vmatpush1.bf16.msra.mxu0 %v2311_v51  ;;  %v2317_v48 = vpack.c.bf16 %v856_v46, %v852_v45  ;;  %v855_v51 = vld [vmem:[#allocation9 + $0x2e0] sm:$0xff]  ;;  %v2445_v52 = vpack.c.bf16 %v858_v49, %v854_v47  ;;  %v894_v45 = vld [vmem:[#allocation9 + $0x418] sm:$0xff]  ;;  %v506_v49 = vlaneseq }
 0x370   :  { %2314 = vmatprep.subr.bf16.mxu0 %v2313_v36  ;;  %v2319_v53 = vpack.c.bf16 %v855_v51, %v851_v50  ;;  %v883_v36 = vld [vmem:[#allocation9 + $0x3c0] sm:$0xff]  ;;  %v898_v47 = vld [vmem:[#allocation9 + $0x438] sm:$0xff] }
 0x371   :  { %v3113_v50 = vshrl.u32 %v506_v49, 7 }
 0x372   :  { %2412 = vmatpush1.bf16.msra.mxu1 %v2411_v54  ;;  %v853_v54 = vld [vmem:[#allocation9 + $0x2d0] sm:$0xff] }
 0x373   :  { %2414 = vmatprep.subr.bf16.mxu1 %v2413_v55  ;;  %2316 = vmatpush1.bf16.msra.mxu0 %v2315_v41  ;;  %v857_v55 = vld [vmem:[#allocation9 + $0x2f0] sm:$0xff]  ;;  %v2335_v41 = vpack.c.bf16 %v887_v37, %v883_v36  ;;  %v3116_v51 = vsub.s32 0, %v3113_v50 }
 0x374   :  { %2318 = vmatprep.subr.bf16.mxu0 %v2317_v48  ;;  %v2447_v56 = vpack.c.bf16 %v857_v55, %v853_v54  ;;  %v2465_v48 = vpack.c.bf16 %v898_v47, %v894_v45  ;;  %v3127_v54 = vsub.s32 1, %v3113_v50  ;;  %v920_v45 = vld [vmem:[#allocation9 + $0x4e8] sm:$0xff]  ;;  %v922_v47 = vld [vmem:[#allocation9 + $0x4f8] sm:$0xff] }
 0x376   :  { %2416 = vmatpush1.bf16.msra.mxu1 %v2415_v59  ;;  %v2321_v59 = vpack.c.bf16 %v864_v58, %v860_v57 }
 0x377   :  { %2418 = vmatprep.subr.bf16.mxu1 %v2417_v60  ;;  %2320 = vmatpush1.bf16.msra.mxu0 %v2319_v53  ;;  %v866_v60 = vld [vmem:[#allocation9 + $0x338] sm:$0xff]  ;;  %v3124_v53 = vld [vmem:[%s3202_s8] sm:$0x1f] }
 0x378   :  { %v2449_v63 = vpack.c.bf16 %v866_v60, %v862_v24  ;;  %2322 = vmatprep.subr.bf16.mxu0 %v2321_v59  ;;  %v509_v55 = vrot.slane %v3124_v53, %v3116_v51  ;;  %v513_v57 = vrot.slane %v3124_v53, %v3127_v54 }
 0x37a   :  { %2420 = vmatpush1.bf16.msra.mxu1 %v2419_v3  ;;  %v861_v3 = vld [vmem:[#allocation9 + $0x310] sm:$0xff] }
 0x37b   :  { %2422 = vmatprep.subr.bf16.mxu1 %v2421_v4  ;;  %v865_v4 = vld [vmem:[#allocation9 + $0x330] sm:$0xff]  ;;  %2324 = vmatpush1.bf16.msra.mxu0 %v2323_v2 }
 0x37c   :  { %v2451_v6 = vpack.c.bf16 %v865_v4, %v861_v3 }
 0x37e   :  { %2424 = vmatpush1.bf16.msra.mxu1 %v2423_v9  ;;  %v874_v9 = vld [vmem:[#allocation9 + $0x378] sm:$0xff] }
 0x37f   :  { %2426 = vmatprep.subr.bf16.mxu1 %v2425_v10  ;;  %v2325_v10 = vpack.c.bf16 %v872_v7, %v868_v5  ;;  %v2453_v11 = vpack.c.bf16 %v874_v9, %v870_v8  ;;  %v891_v9 = vld [vmem:[#allocation9 + $0x400] sm:$0xff] }
 0x381   :  { %2326 = vmatprep.subr.bf16.mxu0 %v2325_v10  ;;  %v895_v10 = vld [vmem:[#allocation9 + $0x420] sm:$0xff] }
 0x382   :  { %2428 = vmatpush1.bf16.msra.mxu1 %v2427_v15  ;;  %v2327_v15 = vpack.c.bf16 %v871_v13, %v867_v12  ;;  %v893_v12 = vld [vmem:[#allocation9 + $0x410] sm:$0xff] }
 0x383   :  { %2430 = vmatprep.subr.bf16.mxu1 %v2429_v16  ;;  %v873_v16 = vld [vmem:[#allocation9 + $0x370] sm:$0xff] }
 0x384   :  { %v2455_v19 = vpack.c.bf16 %v873_v16, %v869_v14  ;;  %2328 = vmatpush1.bf16.msra.mxu0 %v2327_v15  ;;  %v897_v13 = vld [vmem:[#allocation9 + $0x430] sm:$0xff]  ;;  %v900_v14 = vld [vmem:[#allocation9 + $0x448] sm:$0xff] }
 0x385   :  { %2330 = vmatprep.subr.bf16.mxu0 %v2329_v20  ;;  %v904_v16 = vld [vmem:[#allocation9 + $0x468] sm:$0xff]  ;;  %v2339_v20 = vpack.c.bf16 %v895_v10, %v891_v9  ;;  %v923_v9 = vld [vmem:[#allocation9 + $0x500] sm:$0xff] }
 0x386   :  { %2432 = vmatpush1.bf16.msra.mxu1 %v2431_v21  ;;  %v878_v21 = vld [vmem:[#allocation9 + $0x398] sm:$0xff]  ;;  %v927_v10 = vld [vmem:[#allocation9 + $0x520] sm:$0xff] }
 0x387   :  { %2434 = vmatprep.subr.bf16.mxu1 %v2433_v22  ;;  %v882_v22 = vld [vmem:[#allocation9 + $0x3b8] sm:$0xff] }
 0x388   :  { %v2457_v25 = vpack.c.bf16 %v882_v22, %v878_v21  ;;  %v2467_v21 = vpack.c.bf16 %v897_v13, %v893_v12  ;;  %v899_v22 = vld [vmem:[#allocation9 + $0x440] sm:$0xff] }
 0x38a   :  { %2436 = vmatpush1.bf16.msra.mxu1 %v2435_v28  ;;  %v881_v28 = vld [vmem:[#allocation9 + $0x3b0] sm:$0xff] }
 0x38b   :  { %2438 = vmatprep.subr.bf16.mxu1 %v2437_v29  ;;  %v2331_v29 = vpack.c.bf16 %v879_v26, %v875_v23  ;;  %v2459_v33 = vpack.c.bf16 %v881_v28, %v877_v27  ;;  %v903_v23 = vld [vmem:[#allocation9 + $0x460] sm:$0xff]  ;;  %v2341_v26 = vpack.c.bf16 %v904_v16, %v900_v14  ;;  %v2469_v27 = vpack.c.bf16 %v906_v18, %v902_v17  ;;  %v901_v28 = vld [vmem:[#allocation9 + $0x450] sm:$0xff]  ;;  %v932_v16 = vld [vmem:[#allocation9 + $0x548] sm:$0xff] }
 0x38c   :  { %v2343_v36 = vpack.c.bf16 %v903_v23, %v899_v22  ;;  %v925_v14 = vld [vmem:[#allocation9 + $0x510] sm:$0xff]  ;;  %v936_v17 = vld [vmem:[#allocation9 + $0x568] sm:$0xff]  ;;  %v934_v18 = vld [vmem:[#allocation9 + $0x558] sm:$0xff] }
 0x38d   :  { %2332 = vmatpush1.bf16.msra.mxu0 %v2331_v29  ;;  %v905_v29 = vld [vmem:[#allocation9 + $0x470] sm:$0xff]  ;;  %v931_v23 = vld [vmem:[#allocation9 + $0x540] sm:$0xff] }
 0x38e   :  { %2440 = vmatpush1.bf16.msra.mxu1 %v2439_v32  ;;  %v886_v32 = vld [vmem:[#allocation9 + $0x3d8] sm:$0xff]  ;;  %2334 = vmatprep.subr.bf16.mxu0 %v2333_v34  ;;  %v2471_v37 = vpack.c.bf16 %v905_v29, %v901_v28  ;;  %v933_v28 = vld [vmem:[#allocation9 + $0x550] sm:$0xff] }
 0x38f   :  { %2442 = vmatprep.subr.bf16.mxu1 %v2441_v40  ;;  %v2461_v38 = vpack.c.bf16 %v890_v35, %v886_v32  ;;  %v889_v40 = vld [vmem:[#allocation9 + $0x3f0] sm:$0xff]  ;;  %v912_v32 = vld [vmem:[#allocation9 + $0x4a8] sm:$0xff]  ;;  %v914_v34 = vld [vmem:[#allocation9 + $0x4b8] sm:$0xff]  ;;  %v524_v35 = vsub.s32 4, %v3113_v50 }
 0x390   :  { %v2463_v42 = vpack.c.bf16 %v889_v40, %v885_v39  ;;  %v911_v39 = vld [vmem:[#allocation9 + $0x4a0] sm:$0xff]  ;;  %v2345_v40 = vpack.c.bf16 %v912_v32, %v908_v30  ;;  %v937_v29 = vld [vmem:[#allocation9 + $0x570] sm:$0xff]  ;;  %v940_v30 = vld [vmem:[#allocation9 + $0x588] sm:$0xff] }
 0x391   :  { %2336 = vmatpush1.bf16.msra.mxu0 %v2335_v41  ;;  %v942_v32 = vld [vmem:[#allocation9 + $0x598] sm:$0xff] }
 0x392   :  { %2444 = vmatpush1.bf16.msra.mxu1 %v2443_v44  ;;  %v896_v44 = vld [vmem:[#allocation9 + $0x428] sm:$0xff] }
 0x393   :  { %2446 = vmatprep.subr.bf16.mxu1 %v2445_v52  ;;  %v2337_v46 = vpack.c.bf16 %v896_v44, %v892_v43  ;;  %v3119_v52 = vsub.s32 2, %v3113_v50  ;;  %v913_v43 = vld [vmem:[#allocation9 + $0x4b0] sm:$0xff]  ;;  %v916_v44 = vld [vmem:[#allocation9 + $0x4c8] sm:$0xff] }
 0x395   :  { %2338 = vmatprep.subr.bf16.mxu0 %v2337_v46  ;;  %v918_v46 = vld [vmem:[#allocation9 + $0x4d8] sm:$0xff] }
 0x396   :  { %2448 = vmatpush1.bf16.msra.mxu1 %v2447_v56  ;;  %v517_v56 = vrot.slane %v3124_v53, %v3119_v52 }
 0x397   :  { %2450 = vmatprep.subr.bf16.mxu1 %v2449_v63 }
 0x39a   :  { %2452 = vmatpush1.bf16.msra.mxu1 %v2451_v6 }
 0x39b   :  { %2454 = vmatprep.subr.bf16.mxu1 %v2453_v11 }
 0x39e   :  { %2456 = vmatpush1.bf16.msra.mxu1 %v2455_v19 }
 0x39f   :  { %2458 = vmatprep.subr.bf16.mxu1 %v2457_v25 }
 0x3a2   :  { %2460 = vmatpush1.bf16.msra.mxu1 %v2459_v33  ;;  %v910_v33 = vld [vmem:[#allocation9 + $0x498] sm:$0xff] }
 0x3a3   :  { %2462 = vmatprep.subr.bf16.mxu1 %v2461_v38  ;;  %v907_v38 = vld [vmem:[#allocation9 + $0x480] sm:$0xff]  ;;  %v2473_v41 = vpack.c.bf16 %v914_v34, %v910_v33  ;;  %v946_v33 = vld [vmem:[#allocation9 + $0x5b8] sm:$0xff] }
 0x3a4   :  { %v2347_v49 = vpack.c.bf16 %v911_v39, %v907_v38  ;;  %v2489_v39 = vpack.c.bf16 %v946_v33, %v942_v32  ;;  %v975_v32 = vld [vmem:[#allocation9 + $0x6a0] sm:$0xff] }
 0x3a6   :  { %2464 = vmatpush1.bf16.msra.mxu1 %v2463_v42  ;;  %v909_v42 = vld [vmem:[#allocation9 + $0x490] sm:$0xff] }
 0x3a7   :  { %2466 = vmatprep.subr.bf16.mxu1 %v2465_v48  ;;  %v525_v48 = vrot.slane %v3124_v53, %v524_v35  ;;  %v2487_v35 = vpack.c.bf16 %v937_v29, %v933_v28  ;;  %v978_v28 = vld [vmem:[#allocation9 + $0x6b8] sm:$0xff] }
 0x41c   :  { %v597_v58 = vpop.f32.mrb[2].mxu1  ;;  %v668_v24 = vpop.f32.mrb[4].mxu0 }
 0x41d   :  { %v598_v59 = vadd.f32 %v597_v58, %v509_v55  ;;  %v669_v60 = vadd.f32 %v668_v24, %v517_v56  ;;  %v599_v61 = vpop.f32.mrb[3].mxu1  ;;  %v3135_v62 = vpop.f32.mrb[5].mxu0  ;;  %v2475_v55 = vpack.c.bf16 %v913_v43, %v909_v42  ;;  %v915_v56 = vld [vmem:[#allocation9 + $0x4c0] sm:$0xff]  ;;  %v2349_v58 = vpack.c.bf16 %v920_v45, %v916_v44  ;;  %v948_v42 = vld [vmem:[#allocation9 + $0x5c8] sm:$0xff]  ;;  %v950_v44 = vld [vmem:[#allocation9 + $0x5d8] sm:$0xff] }
 0x41e   :  { %v600_v63 = vadd.f32 %v599_v61, %v513_v57  ;;  %v919_v57 = vld [vmem:[#allocation9 + $0x4e0] sm:$0xff]  ;;  %v2477_v24 = vpack.c.bf16 %v922_v47, %v918_v46  ;;  %v924_v61 = vld [vmem:[#allocation9 + $0x508] sm:$0xff]  ;;  %v954_v45 = vld [vmem:[#allocation9 + $0x5f8] sm:$0xff] }
 0x41f   :  { %v744_v2 = vmin.f32 %v598_v59, 0.0  ;;  %1795 = vst [vmem:[%s3207_s13 + $0x10] sm:$0xff] %v669_v60  ;;  %vm743_vm5 = vcmp.gt.f32.partialorder %v598_v59, 0.0  ;;  %v921_v60 = vld [vmem:[#allocation9 + $0x4f0] sm:$0xff]  ;;  %v952_v43 = vld [vmem:[#allocation9 + $0x5e8] sm:$0xff] }
 0x420   :  { %v751_v3 = vmin.f32 %v600_v63, 0.0  ;;  %vm750_vm4 = vcmp.gt.f32.partialorder %v600_v63, 0.0 }
 0x421   :  { %v745_v4 = vmul.f32 1.442695, %v744_v2  ;;  %v928_v2 = vld [vmem:[#allocation9 + $0x528] sm:$0xff] }
 0x422   :  { %v752_v5 = vmul.f32 1.442695, %v751_v3  ;;  %v926_v3 = vld [vmem:[#allocation9 + $0x518] sm:$0xff]  ;;  %v2353_v12 = vpack.c.bf16 %v928_v2, %v924_v61 }
 0x423   :  { %2716 = vpow2.f32 %v745_v4  ;;  %v930_v4 = vld [vmem:[#allocation9 + $0x538] sm:$0xff] }
 0x424   :  { %2718 = vpow2.f32 %v752_v5  ;;  %v2481_v13 = vpack.c.bf16 %v930_v4, %v926_v3  ;;  %v962_v61 = vld [vmem:[#allocation9 + $0x638] sm:$0xff] }
 0x42d   :  { %v2717_v6 = vpop.eup %2716 }
 0x42e   :  { %v2719_v7 = vpop.eup %2718  ;;  %v1812_v8 = vadd.f32 -1.0, %v2717_v6 }
 0x42f   :  { %v1813_v11 = vadd.f32 -1.0, %v2719_v7  ;;  %v2351_v7 = vpack.c.bf16 %v919_v57, %v915_v56  ;;  %v2493_v56 = vpack.c.bf16 %v954_v45, %v950_v44  ;;  %v949_v57 = vld [vmem:[#allocation9 + $0x5d0] sm:$0xff]  ;;  %v983_v44 = vld [vmem:[#allocation9 + $0x6e0] sm:$0xff] }
 0x430   :  { %v748_v15 = vmul.f32 0.25, %v1812_v8 }
 0x431   :  { %v755_v19 = vmul.f32 0.25, %v1813_v11 }
 0x432   :  { %v749_v31 = vsel %vm743_vm5, %v598_v59, %v748_v15  ;;  %v917_v59 = vld [vmem:[#allocation9 + $0x4d0] sm:$0xff] }
 0x433   :  { %v756_v25 = vsel %vm750_vm4, %v600_v63, %v755_v19  ;;  %v2479_v8 = vpack.c.bf16 %v921_v60, %v917_v59  ;;  %v929_v15 = vld [vmem:[#allocation9 + $0x530] sm:$0xff]  ;;  %v938_v19 = vld [vmem:[#allocation9 + $0x578] sm:$0xff]  ;;  %v960_v59 = vld [vmem:[#allocation9 + $0x628] sm:$0xff] }
 0x434   :  { %1105 = vmatprep.mubr.f32.mxu0 %v756_v25  ;;  %1247 = vmatprep.mubr.f32.mxu1 %v756_v25  ;;  %v2483_v22 = vpack.c.bf16 %v929_v15, %v925_v14  ;;  %v935_v25 = vld [vmem:[#allocation9 + $0x560] sm:$0xff]  ;;  %v958_v60 = vld [vmem:[#allocation9 + $0x618] sm:$0xff]  ;;  %v968_v14 = vld [vmem:[#allocation9 + $0x668] sm:$0xff] }
 0x435   :  { %1106 = vmatmul.mubr.f32.vlgmr.msra.gmra.mrb[6].mxu0 %v749_v31  ;;  %1248 = vmatmul.mubr.f32.vlgmr.msra.gmra.mrb[6].mxu1 %v749_v31  ;;  %v944_v31 = vld [vmem:[#allocation9 + $0x5a8] sm:$0xff]  ;;  %v2359_v34 = vpack.c.bf16 %v935_v25, %v931_v23  ;;  %v966_v15 = vld [vmem:[#allocation9 + $0x658] sm:$0xff]  ;;  %v965_v23 = vld [vmem:[#allocation9 + $0x650] sm:$0xff] }
 0x436   :  { %2340 = vmatpush1.bf16.msra.mxu0 %v2339_v20  ;;  %2468 = vmatpush1.bf16.msra.mxu1 %v2467_v21  ;;  %v2355_v21 = vpack.c.bf16 %v927_v10, %v923_v9  ;;  %v2361_v38 = vpack.c.bf16 %v944_v31, %v940_v30  ;;  %v2497_v9 = vpack.c.bf16 %v962_v61, %v958_v60  ;;  %v957_v10 = vld [vmem:[#allocation9 + $0x610] sm:$0xff]  ;;  %v971_v31 = vld [vmem:[#allocation9 + $0x680] sm:$0xff] }
 0x437   :  { %2342 = vmatprep.subr.bf16.mxu0 %v2341_v26  ;;  %2470 = vmatprep.subr.bf16.mxu1 %v2469_v27  ;;  %v2357_v26 = vpack.c.bf16 %v936_v17, %v932_v16  ;;  %v2485_v27 = vpack.c.bf16 %v938_v19, %v934_v18  ;;  %v970_v16 = vld [vmem:[#allocation9 + $0x678] sm:$0xff]  ;;  %v963_v19 = vld [vmem:[#allocation9 + $0x640] sm:$0xff]  ;;  %v969_v25 = vld [vmem:[#allocation9 + $0x670] sm:$0xff] }
 0x438   :  { %v2503_v30 = vpack.c.bf16 %v969_v25, %v965_v23  ;;  %v991_v60 = vld [vmem:[#allocation9 + $0x720] sm:$0xff] }
 0x439   :  { %v1003_v23 = vld [vmem:[#allocation9 + $0x780] sm:$0xff] }
 0x43a   :  { %2344 = vmatpush1.bf16.msra.mxu0 %v2343_v36  ;;  %2472 = vmatpush1.bf16.msra.mxu1 %v2471_v37  ;;  %v939_v36 = vld [vmem:[#allocation9 + $0x580] sm:$0xff] }
 0x43b   :  { %2346 = vmatprep.subr.bf16.mxu0 %v2345_v40  ;;  %2474 = vmatprep.subr.bf16.mxu1 %v2473_v41  ;;  %v943_v37 = vld [vmem:[#allocation9 + $0x5a0] sm:$0xff]  ;;  %v941_v40 = vld [vmem:[#allocation9 + $0x590] sm:$0xff] }
 0x43c   :  { %v739_v63 = vpop.f32.mrb[4].mxu1  ;;  %v945_v41 = vld [vmem:[#allocation9 + $0x5b0] sm:$0xff]  ;;  %v2363_v46 = vpack.c.bf16 %v943_v37, %v939_v36  ;;  %v980_v37 = vld [vmem:[#allocation9 + $0x6c8] sm:$0xff]  ;;  %v1007_v25 = vld [vmem:[#allocation9 + $0x7a0] sm:$0xff] }
 0x43d   :  { %v3142_v5 = vadd.f32 %v739_v63, %v525_v48  ;;  %v2077_v6 = vpop.f32.mrb[5].mxu1  ;;  %v2491_v47 = vpack.c.bf16 %v945_v41, %v941_v40  ;;  %v947_v48 = vld [vmem:[#allocation9 + $0x5c0] sm:$0xff]  ;;  %v977_v36 = vld [vmem:[#allocation9 + $0x6b0] sm:$0xff]  ;;  %v986_v40 = vld [vmem:[#allocation9 + $0x6f8] sm:$0xff]  ;;  %v2379_v41 = vpack.c.bf16 %v975_v32, %v971_v31 }
 0x43e   :  { %2348 = vmatpush1.bf16.msra.mxu0 %v2347_v49  ;;  %2476 = vmatpush1.bf16.msra.mxu1 %v2475_v55  ;;  %v951_v49 = vld [vmem:[#allocation9 + $0x5e0] sm:$0xff]  ;;  %v2365_v55 = vpack.c.bf16 %v952_v43, %v948_v42  ;;  %v1014_v31 = vld [vmem:[#allocation9 + $0x7d8] sm:$0xff] }
 0x43f   :  { %v758_v11 = vmin.f32 %v3142_v5, 0.0  ;;  %2350 = vmatprep.subr.bf16.mxu0 %v2349_v58  ;;  %2478 = vmatprep.subr.bf16.mxu1 %v2477_v24  ;;  %v953_v58 = vld [vmem:[#allocation9 + $0x5f0] sm:$0xff]  ;;  %v956_v24 = vld [vmem:[#allocation9 + $0x608] sm:$0xff]  ;;  %v2367_v3 = vpack.c.bf16 %v951_v49, %v947_v48  ;;  %v955_v6 = vld [vmem:[#allocation9 + $0x600] sm:$0xff]  ;;  %vm757_vm6 = vcmp.gt.f32.partialorder %v3142_v5, 0.0 }
 0x440   :  { %v2495_v4 = vpack.c.bf16 %v953_v58, %v949_v57  ;;  %v979_v43 = vld [vmem:[#allocation9 + $0x6c0] sm:$0xff]  ;;  %v985_v48 = vld [vmem:[#allocation9 + $0x6f0] sm:$0xff]  ;;  %v988_v49 = vld [vmem:[#allocation9 + $0x708] sm:$0xff] }
 0x441   :  { %v759_v20 = vmul.f32 1.442695, %v758_v11  ;;  %v961_v11 = vld [vmem:[#allocation9 + $0x630] sm:$0xff]  ;;  %v994_v57 = vld [vmem:[#allocation9 + $0x738] sm:$0xff]  ;;  %v2383_v58 = vpack.c.bf16 %v983_v44, %v979_v43  ;;  %v1349_v43 = vld [vmem:[#allocation10 + $0x20] sm:$0xff] }
 0x442   :  { %2352 = vmatpush1.bf16.msra.mxu0 %v2351_v7  ;;  %2480 = vmatpush1.bf16.msra.mxu1 %v2479_v8  ;;  %v959_v7 = vld [vmem:[#allocation9 + $0x620] sm:$0xff]  ;;  %v2369_v8 = vpack.c.bf16 %v960_v59, %v956_v24  ;;  %v2499_v18 = vpack.c.bf16 %v961_v11, %v957_v10  ;;  %v1018_v32 = vld [vmem:[#allocation9 + $0x7f8] sm:$0xff]  ;;  %v1395_v44 = vld [vmem:[#allocation10 + $0x190] sm:$0xff] }
 0x443   :  { %2720 = vpow2.f32 %v759_v20  ;;  %2354 = vmatprep.subr.bf16.mxu0 %v2353_v12  ;;  %2482 = vmatprep.subr.bf16.mxu1 %v2481_v13  ;;  %v964_v12 = vld [vmem:[#allocation9 + $0x648] sm:$0xff]  ;;  %v2371_v17 = vpack.c.bf16 %v959_v7, %v955_v6  ;;  %v967_v20 = vld [vmem:[#allocation9 + $0x660] sm:$0xff]  ;;  %v998_v7 = vld [vmem:[#allocation9 + $0x758] sm:$0xff] }
 0x444   :  { %v2375_v29 = vpack.c.bf16 %v967_v20, %v963_v19  ;;  %v987_v59 = vld [vmem:[#allocation9 + $0x700] sm:$0xff]  ;;  %v1000_v6 = vld [vmem:[#allocation9 + $0x768] sm:$0xff]  ;;  %v1006_v19 = vld [vmem:[#allocation9 + $0x798] sm:$0xff] }
 0x445   :  { %v995_v11 = vld [vmem:[#allocation9 + $0x740] sm:$0xff]  ;;  %v1010_v20 = vld [vmem:[#allocation9 + $0x7b8] sm:$0xff] }
 0x446   :  { %2356 = vmatpush1.bf16.msra.mxu0 %v2355_v21  ;;  %2484 = vmatpush1.bf16.msra.mxu1 %v2483_v22  ;;  %v2373_v21 = vpack.c.bf16 %v968_v14, %v964_v12  ;;  %v2501_v22 = vpack.c.bf16 %v970_v16, %v966_v15  ;;  %v999_v12 = vld [vmem:[#allocation9 + $0x760] sm:$0xff]  ;;  %v997_v15 = vld [vmem:[#allocation9 + $0x750] sm:$0xff] }
 0x447   :  { %2358 = vmatprep.subr.bf16.mxu0 %v2357_v26  ;;  %2486 = vmatprep.subr.bf16.mxu1 %v2485_v27  ;;  %v972_v26 = vld [vmem:[#allocation9 + $0x688] sm:$0xff]  ;;  %v1001_v16 = vld [vmem:[#allocation9 + $0x770] sm:$0xff] }
 0x448   :  { %v976_v27 = vld [vmem:[#allocation9 + $0x6a8] sm:$0xff] }
 0x449   :  { %v2377_v33 = vpack.c.bf16 %v976_v27, %v972_v26  ;;  %v2521_v27 = vpack.c.bf16 %v1010_v20, %v1006_v19 }
 0x44a   :  { %2360 = vmatpush1.bf16.msra.mxu0 %v2359_v34  ;;  %2488 = vmatpush1.bf16.msra.mxu1 %v2487_v35  ;;  %v973_v35 = vld [vmem:[#allocation9 + $0x690] sm:$0xff] }
 0x44b   :  { %2362 = vmatprep.subr.bf16.mxu0 %v2361_v38  ;;  %2490 = vmatprep.subr.bf16.mxu1 %v2489_v39  ;;  %v984_v38 = vld [vmem:[#allocation9 + $0x6e8] sm:$0xff]  ;;  %v982_v39 = vld [vmem:[#allocation9 + $0x6d8] sm:$0xff]  ;;  %v2507_v42 = vpack.c.bf16 %v977_v36, %v973_v35  ;;  %v1011_v35 = vld [vmem:[#allocation9 + $0x7c0] sm:$0xff] }
 0x44c   :  { %v2381_v45 = vpack.c.bf16 %v984_v38, %v980_v37  ;;  %v1015_v36 = vld [vmem:[#allocation9 + $0x7e0] sm:$0xff]  ;;  %v520_v37 = vsub.s32 3, %v3113_v50 }
 0x44d   :  { %v2721_v63 = vpop.eup %2720 }
 0x44e   :  { %2364 = vmatpush1.bf16.msra.mxu0 %v2363_v46  ;;  %2492 = vmatpush1.bf16.msra.mxu1 %v2491_v47  ;;  %v1814_v2 = vadd.f32 -1.0, %v2721_v63  ;;  %v2509_v46 = vpack.c.bf16 %v986_v40, %v982_v39  ;;  %v981_v47 = vld [vmem:[#allocation9 + $0x6d0] sm:$0xff]  ;;  %v2525_v39 = vpack.c.bf16 %v1018_v32, %v1014_v31 }
 0x44f   :  { %2366 = vmatprep.subr.bf16.mxu0 %v2365_v55  ;;  %2494 = vmatprep.subr.bf16.mxu1 %v2493_v56  ;;  %v992_v55 = vld [vmem:[#allocation9 + $0x728] sm:$0xff]  ;;  %v990_v56 = vld [vmem:[#allocation9 + $0x718] sm:$0xff]  ;;  %v2511_v24 = vpack.c.bf16 %v985_v48, %v981_v47  ;;  %v1013_v40 = vld [vmem:[#allocation9 + $0x7d0] sm:$0xff] }
 0x450   :  { %v762_v13 = vsel %vm757_vm6, %v3142_v5, %v1814_v2  ;;  %v974_v5 = vld [vmem:[#allocation9 + $0x698] sm:$0xff]  ;;  %v2385_v61 = vpack.c.bf16 %v992_v55, %v988_v49  ;;  %v2513_v63 = vpack.c.bf16 %v994_v57, %v990_v56  ;;  %v989_v2 = vld [vmem:[#allocation9 + $0x710] sm:$0xff]  ;;  %v1345_v48 = vld [vmem:[#allocation10] sm:$0xff]  ;;  %v521_v55 = vrot.slane %v3124_v53, %v520_v37 }
 0x451   :  { %1176 = vmatprep.mubr.f32.mxu0 %v762_v13  ;;  %1318 = vmatprep.mubr.f32.mxu1 %v762_v13  ;;  %v2505_v34 = vpack.c.bf16 %v978_v28, %v974_v5  ;;  %v1005_v5 = vld [vmem:[#allocation9 + $0x790] sm:$0xff]  ;;  %v1348_v49 = vld [vmem:[#allocation10 + $0x18] sm:$0xff]  ;;  %v1354_v53 = vld [vmem:[#allocation10 + $0x48] sm:$0xff] }
 0x452   :  { %2368 = vmatpush1.bf16.msra.mxu0 %v2367_v3  ;;  %2496 = vmatpush1.bf16.msra.mxu1 %v2495_v4  ;;  %v993_v3 = vld [vmem:[#allocation9 + $0x730] sm:$0xff]  ;;  %v996_v4 = vld [vmem:[#allocation9 + $0x748] sm:$0xff]  ;;  %v1352_v57 = vld [vmem:[#allocation10 + $0x38] sm:$0xff] }
 0x453   :  { %2370 = vmatprep.subr.bf16.mxu0 %v2369_v8  ;;  %2498 = vmatprep.subr.bf16.mxu1 %v2497_v9  ;;  %v1002_v8 = vld [vmem:[#allocation9 + $0x778] sm:$0xff]  ;;  %v2387_v9 = vpack.c.bf16 %v991_v60, %v987_v59  ;;  %v2515_v10 = vpack.c.bf16 %v993_v3, %v989_v2  ;;  %v2389_v13 = vpack.c.bf16 %v1000_v6, %v996_v4  ;;  %v1009_v28 = vld [vmem:[#allocation9 + $0x7b0] sm:$0xff]  ;;  %v1350_v59 = vld [vmem:[#allocation10 + $0x28] sm:$0xff] }
 0x454   :  { %v2517_v14 = vpack.c.bf16 %v1002_v8, %v998_v7  ;;  %v1355_v60 = vld [vmem:[#allocation10 + $0x50] sm:$0xff]  ;;  %v2531_v2 = vpack.c.bf16 %v1348_v49, %v1345_v48  ;;  %v671_v6 = vadd.f32 %v3135_v62, %v521_v55  ;;  %v1364_v62 = vld [vmem:[#allocation10 + $0x98] sm:$0xff]  ;;  %v1394_v48 = vld [vmem:[#allocation10 + $0x188] sm:$0xff] }
 0x455   :  { %v1351_v3 = vld [vmem:[#allocation10 + $0x30] sm:$0xff]  ;;  %v2533_v7 = vpack.c.bf16 %v1355_v60, %v1352_v57  ;;  %v1397_v49 = vld [vmem:[#allocation10 + $0x1a0] sm:$0xff] }
 0x456   :  { %2372 = vmatpush1.bf16.msra.mxu0 %v2371_v17  ;;  %2500 = vmatpush1.bf16.msra.mxu1 %v2499_v18  ;;  %v1004_v17 = vld [vmem:[#allocation9 + $0x788] sm:$0xff]  ;;  %v1393_v57 = vld [vmem:[#allocation10 + $0x180] sm:$0xff] }
 0x457   :  { %2374 = vmatprep.subr.bf16.mxu0 %v2373_v21  ;;  %2502 = vmatprep.subr.bf16.mxu1 %v2501_v22  ;;  %v1008_v18 = vld [vmem:[#allocation9 + $0x7a8] sm:$0xff]  ;;  %v2391_v21 = vpack.c.bf16 %v999_v12, %v995_v11  ;;  %v2519_v22 = vpack.c.bf16 %v1001_v16, %v997_v15  ;;  %v1361_v12 = vld [vmem:[#allocation10 + $0x80] sm:$0xff] }
 0x458   :  { %v2393_v26 = vpack.c.bf16 %v1008_v18, %v1004_v17  ;;  %v1358_v11 = vld [vmem:[#allocation10 + $0x68] sm:$0xff]  ;;  %v1357_v16 = vld [vmem:[#allocation10 + $0x60] sm:$0xff]  ;;  %v1360_v17 = vld [vmem:[#allocation10 + $0x78] sm:$0xff] }
 0x459   :  { %v2537_v15 = vpack.c.bf16 %v1361_v12, %v1358_v11  ;;  %v1367_v18 = vld [vmem:[#allocation10 + $0xb0] sm:$0xff]  ;;  %v2539_v19 = vpack.c.bf16 %v1360_v17, %v1357_v16  ;;  %v1408_v11 = vld [vmem:[#allocation10 + $0x1f8] sm:$0xff] }
 0x45a   :  { %2376 = vmatpush1.bf16.msra.mxu0 %v2375_v29  ;;  %2504 = vmatpush1.bf16.msra.mxu1 %v2503_v30  ;;  %v1012_v29 = vld [vmem:[#allocation9 + $0x7c8] sm:$0xff]  ;;  %v2541_v20 = vpack.c.bf16 %v1367_v18, %v1364_v62  ;;  %v1359_v12 = vld [vmem:[#allocation10 + $0x70] sm:$0xff]  ;;  %v1412_v16 = vld [vmem:[#allocation10 + $0x218] sm:$0xff] }
 0x45b   :  { %2378 = vmatprep.subr.bf16.mxu0 %v2377_v33  ;;  %2506 = vmatprep.subr.bf16.mxu1 %v2505_v34  ;;  %v1016_v30 = vld [vmem:[#allocation9 + $0x7e8] sm:$0xff]  ;;  %v2395_v33 = vpack.c.bf16 %v1007_v25, %v1003_v23  ;;  %v2523_v34 = vpack.c.bf16 %v1009_v28, %v1005_v5  ;;  %v1373_v25 = vld [vmem:[#allocation10 + $0xe0] sm:$0xff]  ;;  %v1372_v28 = vld [vmem:[#allocation10 + $0xd8] sm:$0xff] }
 0x45c   :  { %v2397_v38 = vpack.c.bf16 %v1016_v30, %v1012_v29  ;;  %v1370_v23 = vld [vmem:[#allocation10 + $0xc8] sm:$0xff]  ;;  %v1369_v5 = vld [vmem:[#allocation10 + $0xc0] sm:$0xff]  ;;  %v1376_v29 = vld [vmem:[#allocation10 + $0xf8] sm:$0xff] }
 0x45d   :  { %v1379_v30 = vld [vmem:[#allocation10 + $0x110] sm:$0xff]  ;;  %v2547_v31 = vpack.c.bf16 %v1372_v28, %v1369_v5  ;;  %v1413_v62 = vld [vmem:[#allocation10 + $0x220] sm:$0xff]  ;;  %v1418_v5 = vld [vmem:[#allocation10 + $0x248] sm:$0xff] }
 0x45e   :  { %2380 = vmatpush1.bf16.msra.mxu0 %v2379_v41  ;;  %2508 = vmatpush1.bf16.msra.mxu1 %v2507_v42  ;;  %v1017_v41 = vld [vmem:[#allocation9 + $0x7f0] sm:$0xff]  ;;  %v1346_v42 = vld [vmem:[#allocation10 + $0x8] sm:$0xff]  ;;  %v2549_v32 = vpack.c.bf16 %v1379_v30, %v1376_v29  ;;  %v1421_v28 = vld [vmem:[#allocation10 + $0x260] sm:$0xff] }
 0x45f   :  { %2382 = vmatprep.subr.bf16.mxu0 %v2381_v45  ;;  %2510 = vmatprep.subr.bf16.mxu1 %v2509_v46  ;;  %v1398_v45 = vld [vmem:[#allocation10 + $0x1a8] sm:$0xff]  ;;  %v2399_v46 = vpack.c.bf16 %v1015_v36, %v1011_v35  ;;  %v2527_v47 = vpack.c.bf16 %v1017_v41, %v1013_v40  ;;  %v2529_v56 = vpack.c.bf16 %v1349_v43, %v1346_v42  ;;  %v1385_v36 = vld [vmem:[#allocation10 + $0x140] sm:$0xff]  ;;  %v1384_v41 = vld [vmem:[#allocation10 + $0x138] sm:$0xff] }
 0x460   :  { %v1382_v35 = vld [vmem:[#allocation10 + $0x128] sm:$0xff]  ;;  %v1381_v40 = vld [vmem:[#allocation10 + $0x120] sm:$0xff]  ;;  %v1388_v42 = vld [vmem:[#allocation10 + $0x158] sm:$0xff]  ;;  %v2577_v30 = vpack.c.bf16 %v1421_v28, %v1418_v5 }
 0x461   :  { %v1391_v43 = vld [vmem:[#allocation10 + $0x170] sm:$0xff] }
 0x462   :  { %2384 = vmatpush1.bf16.msra.mxu0 %v2383_v58  ;;  %2512 = vmatpush1.bf16.msra.mxu1 %v2511_v24  ;;  %v2625_v58 = vpack.c.bf16 %v1398_v45, %v1395_v44  ;;  %v1347_v24 = vld [vmem:[#allocation10 + $0x10] sm:$0xff]  ;;  %v2555_v44 = vpack.c.bf16 %v1384_v41, %v1381_v40  ;;  %v2557_v45 = vpack.c.bf16 %v1391_v43, %v1388_v42  ;;  %v1424_v40 = vld [vmem:[#allocation10 + $0x278] sm:$0xff]  ;;  %v1425_v42 = vld [vmem:[#allocation10 + $0x280] sm:$0xff] }
 0x463   :  { %2386 = vmatprep.subr.bf16.mxu0 %v2385_v61  ;;  %2514 = vmatprep.subr.bf16.mxu1 %v2513_v63  ;;  %v1401_v61 = vld [vmem:[#allocation10 + $0x1c0] sm:$0xff]  ;;  %v1404_v63 = vld [vmem:[#allocation10 + $0x1d8] sm:$0xff]  ;;  %v2627_v4 = vpack.c.bf16 %v1350_v59, %v1347_v24  ;;  %v1403_v59 = vld [vmem:[#allocation10 + $0x1d0] sm:$0xff] }
 0x464   :  { %v2629_v8 = vpack.c.bf16 %v1404_v63, %v1401_v61  ;;  %v1400_v24 = vld [vmem:[#allocation10 + $0x1b8] sm:$0xff]  ;;  %v1399_v63 = vld [vmem:[#allocation10 + $0x1b0] sm:$0xff] }
 0x465   :  { %v2565_v61 = vpack.c.bf16 %v1403_v59, %v1400_v24  ;;  %v1415_v17 = vld [vmem:[#allocation10 + $0x230] sm:$0xff] }
 0x466   :  { %2388 = vmatpush1.bf16.msra.mxu0 %v2387_v9  ;;  %2516 = vmatpush1.bf16.msra.mxu1 %v2515_v10  ;;  %v1353_v9 = vld [vmem:[#allocation10 + $0x40] sm:$0xff]  ;;  %v1356_v10 = vld [vmem:[#allocation10 + $0x58] sm:$0xff]  ;;  %v2573_v18 = vpack.c.bf16 %v1415_v17, %v1412_v16  ;;  %v1419_v29 = vld [vmem:[#allocation10 + $0x250] sm:$0xff] }
 0x467   :  { %2390 = vmatprep.subr.bf16.mxu0 %v2389_v13  ;;  %2518 = vmatprep.subr.bf16.mxu1 %v2517_v14  ;;  %v2535_v13 = vpack.c.bf16 %v1354_v53, %v1351_v3  ;;  %v2631_v14 = vpack.c.bf16 %v1356_v10, %v1353_v9  ;;  %v1405_v10 = vld [vmem:[#allocation10 + $0x1e0] sm:$0xff]  ;;  %v1427_v41 = vld [vmem:[#allocation10 + $0x290] sm:$0xff]  ;;  %v1392_v17 = vld [vmem:[#allocation10 + $0x178] sm:$0xff] }
 0x468   :  { %v2581_v43 = vpack.c.bf16 %v1427_v41, %v1424_v40  ;;  %v1431_v24 = vld [vmem:[#allocation10 + $0x2b0] sm:$0xff]  ;;  %v1389_v16 = vld [vmem:[#allocation10 + $0x160] sm:$0xff] }
 0x46a   :  { %2392 = vmatpush1.bf16.msra.mxu0 %v2391_v21  ;;  %2520 = vmatpush1.bf16.msra.mxu1 %v2519_v22  ;;  %v1363_v21 = vld [vmem:[#allocation10 + $0x90] sm:$0xff]  ;;  %v1366_v22 = vld [vmem:[#allocation10 + $0xa8] sm:$0xff] }
 0x46b   :  { %2394 = vmatprep.subr.bf16.mxu0 %v2393_v26  ;;  %2522 = vmatprep.subr.bf16.mxu1 %v2521_v27  ;;  %v2543_v26 = vpack.c.bf16 %v1366_v22, %v1363_v21  ;;  %v2545_v27 = vpack.c.bf16 %v1373_v25, %v1370_v23  ;;  %v1414_v21 = vld [vmem:[#allocation10 + $0x228] sm:$0xff]  ;;  %v1365_v25 = vld [vmem:[#allocation10 + $0xa0] sm:$0xff] }
 0x46e   :  { %2396 = vmatpush1.bf16.msra.mxu0 %v2395_v33  ;;  %2524 = vmatpush1.bf16.msra.mxu1 %v2523_v34  ;;  %v1375_v33 = vld [vmem:[#allocation10 + $0xf0] sm:$0xff]  ;;  %v1378_v34 = vld [vmem:[#allocation10 + $0x108] sm:$0xff] }
 0x46f   :  { %2398 = vmatprep.subr.bf16.mxu0 %v2397_v38  ;;  %2526 = vmatprep.subr.bf16.mxu1 %v2525_v39  ;;  %v2551_v38 = vpack.c.bf16 %v1378_v34, %v1375_v33  ;;  %v2553_v39 = vpack.c.bf16 %v1385_v36, %v1382_v35  ;;  %v1420_v33 = vld [vmem:[#allocation10 + $0x258] sm:$0xff]  ;;  %v1371_v36 = vld [vmem:[#allocation10 + $0xd0] sm:$0xff] }
 0x472   :  { %2400 = vmatpush1.bf16.msra.mxu0 %v2399_v46  ;;  %2528 = vmatpush1.bf16.msra.mxu1 %v2527_v47  ;;  %v1387_v46 = vld [vmem:[#allocation10 + $0x150] sm:$0xff]  ;;  %v1390_v47 = vld [vmem:[#allocation10 + $0x168] sm:$0xff] }
 0x473   :  { %2530 = vmatprep.subr.bf16.mxu0 %v2529_v56  ;;  %2626 = vmatprep.subr.bf16.mxu1 %v2625_v58  ;;  %v2559_v55 = vpack.c.bf16 %v1390_v47, %v1387_v46  ;;  %v2561_v56 = vpack.c.bf16 %v1397_v49, %v1394_v48  ;;  %v1396_v58 = vld [vmem:[#allocation10 + $0x198] sm:$0xff]  ;;  %v1426_v46 = vld [vmem:[#allocation10 + $0x288] sm:$0xff]  ;;  %v1377_v49 = vld [vmem:[#allocation10 + $0x100] sm:$0xff] }
 0x474   :  { %v2563_v60 = vpack.c.bf16 %v1396_v58, %v1393_v57  ;;  %v1430_v57 = vld [vmem:[#allocation10 + $0x2a8] sm:$0xff]  ;;  %v1433_v58 = vld [vmem:[#allocation10 + $0x2c0] sm:$0xff] }
 0x475   :  { %1177 = vmatmul.mubr.f32.vlgmr.msra.gmra.mrb[6].mxu0 %v671_v6  ;;  %1319 = vmatmul.mubr.f32.vlgmr.msra.gmra.mrb[6].mxu1 %v671_v6  ;;  %v1409_v6 = vld [vmem:[#allocation10 + $0x200] sm:$0xff]  ;;  %v2585_v59 = vpack.c.bf16 %v1433_v58, %v1430_v57 }
 0x476   :  { %2532 = vmatpush1.bf16.msra.mxu0 %v2531_v2  ;;  %2628 = vmatpush3.bf16.msra.mxu1 %v2627_v4  ;;  %v1402_v2 = vld [vmem:[#allocation10 + $0x1c8] sm:$0xff] }
 0x477   :  { %2534 = vmatprep.subr.bf16.mxu0 %v2533_v7  ;;  %2630 = vmatprep.subr.bf16.mxu1 %v2629_v8  ;;  %v2567_v3 = vpack.c.bf16 %v1402_v2, %v1399_v63  ;;  %v1406_v4 = vld [vmem:[#allocation10 + $0x1e8] sm:$0xff]  ;;  %v1407_v7 = vld [vmem:[#allocation10 + $0x1f0] sm:$0xff]  ;;  %v1432_v63 = vld [vmem:[#allocation10 + $0x2b8] sm:$0xff] }
 0x478   :  { %v2569_v53 = vpack.c.bf16 %v1409_v6, %v1406_v4  ;;  %v1410_v8 = vld [vmem:[#allocation10 + $0x208] sm:$0xff]  ;;  %v1383_v4 = vld [vmem:[#allocation10 + $0x130] sm:$0xff] }
 0x479   :  { %v2633_v9 = vpack.c.bf16 %v1410_v8, %v1407_v7  ;;  %v1386_v6 = vld [vmem:[#allocation10 + $0x148] sm:$0xff]  ;;  %v1439_v8 = vld [vmem:[#allocation10 + $0x2f0] sm:$0xff] }
 0x47a   :  { %2536 = vmatpush1.bf16.msra.mxu0 %v2535_v13  ;;  %2632 = vmatpush3.bf16.msra.mxu1 %v2631_v14  ;;  %v2571_v13 = vpack.c.bf16 %v1408_v11, %v1405_v10  ;;  %v1362_v14 = vld [vmem:[#allocation10 + $0x88] sm:$0xff]  ;;  %v2651_v7 = vpack.c.bf16 %v1386_v6, %v1383_v4  ;;  %v1440_v11 = vld [vmem:[#allocation10 + $0x2f8] sm:$0xff] }
 0x47b   :  { %2538 = vmatprep.subr.bf16.mxu0 %v2537_v15  ;;  %2634 = vmatprep.subr.bf16.mxu1 %v2633_v9  ;;  %v2635_v15 = vpack.c.bf16 %v1362_v14, %v1359_v12  ;;  %v1437_v9 = vld [vmem:[#allocation10 + $0x2e0] sm:$0xff]  ;;  %v1435_v12 = vld [vmem:[#allocation10 + $0x2d0] sm:$0xff]  ;;  %v1452_v4 = vld [vmem:[#allocation10 + $0x358] sm:$0xff] }
 0x47c   :  { %v2653_v14 = vpack.c.bf16 %v1440_v11, %v1437_v9 }
 0x47e   :  { %2540 = vmatpush1.bf16.msra.mxu0 %v2539_v19  ;;  %2636 = vmatpush3.bf16.msra.mxu1 %v2635_v15  ;;  %v1416_v19 = vld [vmem:[#allocation10 + $0x238] sm:$0xff] }
 0x47f   :  { %2542 = vmatprep.subr.bf16.mxu0 %v2541_v20  ;;  %v1411_v20 = vld [vmem:[#allocation10 + $0x210] sm:$0xff]  ;;  %v2637_v22 = vpack.c.bf16 %v1416_v19, %v1413_v62  ;;  %v2655_v62 = vpack.c.bf16 %v1392_v17, %v1389_v16  ;;  %v1445_v19 = vld [vmem:[#allocation10 + $0x320] sm:$0xff] }
 0x480   :  { %v2575_v23 = vpack.c.bf16 %v1414_v21, %v1411_v20  ;;  %v1019_v21 = vld [vmem:[%s3204_s10] sm:$0xf] }
 0x481   :  { %2638 = vmatprep.subr.bf16.mxu1 %v2637_v22  ;;  %v1024_v22 = vrot.slane %v1019_v21, %v3116_v51 }
 0x482   :  { %2544 = vmatpush1.bf16.msra.mxu0 %v2543_v26  ;;  %v1368_v26 = vld [vmem:[#allocation10 + $0xb8] sm:$0xff] }
 0x483   :  { %2546 = vmatprep.subr.bf16.mxu0 %v2545_v27  ;;  %v2639_v27 = vpack.c.bf16 %v1368_v26, %v1365_v25  ;;  %v1028_v25 = vrot.slane %v1019_v21, %v3127_v54 }
 0x485   :  { %2640 = vmatpush3.bf16.msra.mxu1 %v2639_v27 }
 0x486   :  { %2548 = vmatpush1.bf16.msra.mxu0 %v2547_v31  ;;  %v1422_v31 = vld [vmem:[#allocation10 + $0x268] sm:$0xff] }
 0x487   :  { %2550 = vmatprep.subr.bf16.mxu0 %v2549_v32  ;;  %v1417_v32 = vld [vmem:[#allocation10 + $0x240] sm:$0xff]  ;;  %v2641_v34 = vpack.c.bf16 %v1422_v31, %v1419_v29 }
 0x488   :  { %v2579_v35 = vpack.c.bf16 %v1420_v33, %v1417_v32 }
 0x489   :  { %2642 = vmatprep.subr.bf16.mxu1 %v2641_v34 }
 0x48a   :  { %2552 = vmatpush1.bf16.msra.mxu0 %v2551_v38  ;;  %v1374_v38 = vld [vmem:[#allocation10 + $0xe8] sm:$0xff] }
 0x48b   :  { %2554 = vmatprep.subr.bf16.mxu0 %v2553_v39  ;;  %v2643_v39 = vpack.c.bf16 %v1374_v38, %v1371_v36 }
 0x48d   :  { %2644 = vmatpush3.bf16.msra.mxu1 %v2643_v39 }
 0x48e   :  { %2556 = vmatpush1.bf16.msra.mxu0 %v2555_v44  ;;  %v1428_v44 = vld [vmem:[#allocation10 + $0x298] sm:$0xff] }
 0x48f   :  { %2558 = vmatprep.subr.bf16.mxu0 %v2557_v45  ;;  %v1423_v45 = vld [vmem:[#allocation10 + $0x270] sm:$0xff]  ;;  %v2645_v47 = vpack.c.bf16 %v1428_v44, %v1425_v42  ;;  %v1441_v44 = vld [vmem:[#allocation10 + $0x300] sm:$0xff] }
 0x490   :  { %v2583_v48 = vpack.c.bf16 %v1426_v46, %v1423_v45  ;;  %v1444_v46 = vld [vmem:[#allocation10 + $0x318] sm:$0xff] }
 0x491   :  { %2646 = vmatprep.subr.bf16.mxu1 %v2645_v47  ;;  %v1443_v47 = vld [vmem:[#allocation10 + $0x310] sm:$0xff]  ;;  %v2595_v58 = vpack.c.bf16 %v1444_v46, %v1441_v44  ;;  %v1481_v44 = vld [vmem:[#allocation10 + $0x440] sm:$0xff] }
 0x492   :  { %2560 = vmatpush1.bf16.msra.mxu0 %v2559_v55  ;;  %v1380_v55 = vld [vmem:[#allocation10 + $0x118] sm:$0xff] }
 0x493   :  { %2562 = vmatprep.subr.bf16.mxu0 %v2561_v56  ;;  %v2647_v56 = vpack.c.bf16 %v1380_v55, %v1377_v49  ;;  %v1448_v55 = vld [vmem:[#allocation10 + $0x338] sm:$0xff] }
 0x495   :  { %2648 = vmatpush3.bf16.msra.mxu1 %v2647_v56  ;;  %v1451_v56 = vld [vmem:[#allocation10 + $0x350] sm:$0xff] }
 0x496   :  { %2564 = vmatpush1.bf16.msra.mxu0 %v2563_v60  ;;  %v1434_v60 = vld [vmem:[#allocation10 + $0x2c8] sm:$0xff] }
 0x497   :  { %2566 = vmatprep.subr.bf16.mxu0 %v2565_v61  ;;  %v1429_v61 = vld [vmem:[#allocation10 + $0x2a0] sm:$0xff]  ;;  %v2649_v2 = vpack.c.bf16 %v1434_v60, %v1431_v24  ;;  %v1036_v60 = vrot.slane %v1019_v21, %v520_v37  ;;  %v1456_v37 = vld [vmem:[#allocation10 + $0x378] sm:$0xff] }
 0x499   :  { %2650 = vmatprep.subr.bf16.mxu1 %v2649_v2  ;;  %v1450_v2 = vld [vmem:[#allocation10 + $0x348] sm:$0xff] }
 0x49a   :  { %2568 = vmatpush1.bf16.msra.mxu0 %v2567_v3  ;;  %v2587_v3 = vpack.c.bf16 %v1432_v63, %v1429_v61  ;;  %2652 = vmatpush3.bf16.msra.mxu1 %v2651_v7  ;;  %v2597_v63 = vpack.c.bf16 %v1451_v56, %v1448_v55  ;;  %v1454_v7 = vld [vmem:[#allocation10 + $0x368] sm:$0xff]  ;;  %v1479_v55 = vld [vmem:[#allocation10 + $0x430] sm:$0xff] }
 0x49b   :  { %2570 = vmatprep.subr.bf16.mxu0 %v2569_v53  ;;  %v1436_v53 = vld [vmem:[#allocation10 + $0x2d8] sm:$0xff]  ;;  %2654 = vmatprep.subr.bf16.mxu1 %v2653_v14  ;;  %v1482_v56 = vld [vmem:[#allocation10 + $0x448] sm:$0xff] }
 0x49c   :  { %v2589_v10 = vpack.c.bf16 %v1439_v8, %v1436_v53  ;;  %v1457_v53 = vld [vmem:[#allocation10 + $0x380] sm:$0xff]  ;;  %v1460_v14 = vld [vmem:[#allocation10 + $0x398] sm:$0xff] }
 0x49d   :  { %v2601_v50 = vpack.c.bf16 %v1457_v53, %v1454_v7 }
 0x49e   :  { %2572 = vmatpush1.bf16.msra.mxu0 %v2571_v13  ;;  %v1438_v13 = vld [vmem:[#allocation10 + $0x2e8] sm:$0xff]  ;;  %2656 = vmatpush3.bf16.msra.mxu1 %v2655_v62 }
 0x49f   :  { %2574 = vmatprep.subr.bf16.mxu0 %v2573_v18  ;;  %v2591_v15 = vpack.c.bf16 %v1438_v13, %v1435_v12  ;;  %v1442_v18 = vld [vmem:[#allocation10 + $0x308] sm:$0xff]  ;;  %2657 = vmatprep.subr.bf16.mxu1 %v2886_v0  ;;  %v1455_v12 = vld [vmem:[#allocation10 + $0x370] sm:$0xff] }
 0x4a0   :  { %v2593_v20 = vpack.c.bf16 %v1445_v19, %v1442_v18  ;;  %v1458_v13 = vld [vmem:[#allocation10 + $0x388] sm:$0xff]  ;;  %v1459_v18 = vld [vmem:[#allocation10 + $0x390] sm:$0xff] }
 0x4a1   :  { %v2664_v62 = vpack.c.bf16 %v1458_v13, %v1455_v12 }
 0x4a2   :  { %2576 = vmatpush1.bf16.msra.mxu0 %v2575_v23  ;;  %v1032_v23 = vrot.slane %v1019_v21, %v3119_v52  ;;  %v1462_v21 = vld [vmem:[#allocation10 + $0x3a8] sm:$0xff] }
 0x4a3   :  { %2578 = vmatprep.subr.bf16.mxu0 %v2577_v30 }
 0x4a6   :  { %2580 = vmatpush1.bf16.msra.mxu0 %v2579_v35 }
 0x4a7   :  { %2582 = vmatprep.subr.bf16.mxu0 %v2581_v43 }
 0x4aa   :  { %2584 = vmatpush1.bf16.msra.mxu0 %v2583_v48  ;;  %v1446_v48 = vld [vmem:[#allocation10 + $0x328] sm:$0xff] }
 0x4ab   :  { %2586 = vmatprep.subr.bf16.mxu0 %v2585_v59  ;;  %v2658_v24 = vpack.c.bf16 %v1446_v48, %v1443_v47  ;;  %v1447_v59 = vld [vmem:[#allocation10 + $0x330] sm:$0xff]  ;;  %v1477_v47 = vld [vmem:[#allocation10 + $0x420] sm:$0xff] }
 0x4ac   :  { %v2599_v8 = vpack.c.bf16 %v1450_v2, %v1447_v59  ;;  %v2676_v59 = vpack.c.bf16 %v1482_v56, %v1479_v55  ;;  %v1485_v2 = vld [vmem:[#allocation10 + $0x460] sm:$0xff] }
 0x4ae   :  { %2588 = vmatpush1.bf16.msra.mxu0 %v2587_v3  ;;  %v1449_v3 = vld [vmem:[#allocation10 + $0x340] sm:$0xff] }
 0x4af   :  { %2590 = vmatprep.subr.bf16.mxu0 %v2589_v10  ;;  %v2661_v9 = vpack.c.bf16 %v1452_v4, %v1449_v3  ;;  %v1453_v10 = vld [vmem:[#allocation10 + $0x360] sm:$0xff]  ;;  %v1488_v3 = vld [vmem:[#allocation10 + $0x478] sm:$0xff] }
 0x4b0   :  { %v2603_v17 = vpack.c.bf16 %v1456_v37, %v1453_v10  ;;  %v2679_v7 = vpack.c.bf16 %v1488_v3, %v1485_v2  ;;  %v1489_v37 = vld [vmem:[%s3206_s12] sm:$0x7] }
 0x4b1   :  { %v1502_v12 = vrot.slane %v1489_v37, %v3119_v52  ;;  %v1498_v13 = vrot.slane %v1489_v37, %v3127_v54 }
 0x4b2   :  { %2592 = vmatpush1.bf16.msra.mxu0 %v2591_v15  ;;  %v1463_v15 = vld [vmem:[#allocation10 + $0x3b0] sm:$0xff] }
 0x4b3   :  { %2594 = vmatprep.subr.bf16.mxu0 %v2593_v20  ;;  %v2605_v20 = vpack.c.bf16 %v1463_v15, %v1460_v14 }
 0x548   :  { %v1178_v26 = vpop.f32.mrb[6].mxu0  ;;  %v1320_v27 = vpop.f32.mrb[6].mxu1 }
 0x549   :  { %v2681_v5 = vadd.f32 %v1178_v26, %v1024_v22  ;;  %v2683_v28 = vadd.f32 %v1320_v27, %v1032_v23  ;;  %v1180_v29 = vpop.f32.mrb[7].mxu0  ;;  %v1322_v30 = vpop.f32.mrb[7].mxu1  ;;  %v1461_v22 = vld [vmem:[#allocation10 + $0x3a0] sm:$0xff]  ;;  %v1464_v23 = vld [vmem:[#allocation10 + $0x3b8] sm:$0xff]  ;;  %v2607_v26 = vpack.c.bf16 %v1462_v21, %v1459_v18 }
 0x54a   :  { %v2682_v31 = vadd.f32 %v1180_v29, %v1028_v25  ;;  %v3161_v11 = vadd.f32 %v1322_v30, %v1036_v60  ;;  %v1469_v25 = vld [vmem:[#allocation10 + $0x3e0] sm:$0xff]  ;;  %v2667_v27 = vpack.c.bf16 %v1464_v23, %v1461_v22  ;;  %v1468_v30 = vld [vmem:[#allocation10 + $0x3d8] sm:$0xff]  ;;  %v1483_v60 = vld [vmem:[#allocation10 + $0x450] sm:$0xff] }
 0x54b   :  { %v1326_v32 = vmin.f32 %v2681_v5, 0.0  ;;  %v1788_v33 = vsub.f32 0.0, %v2683_v28  ;;  %vm1325_vm8 = vcmp.gt.f32.partialorder %v2681_v5, 0.0 }
 0x54c   :  { %v1333_v34 = vmin.f32 %v2682_v31, 0.0  ;;  %vm1332_vm7 = vcmp.gt.f32.partialorder %v2682_v31, 0.0  ;;  %v1340_v19 = vmin.f32 %v3161_v11, 0.0  ;;  %vm1339_vm9 = vcmp.gt.f32.partialorder %v3161_v11, 0.0 }
 0x54d   :  { %v1327_v35 = vmul.f32 1.442695, %v1326_v32  ;;  %v1789_v36 = vmul.f32 1.442695, %v1788_v33  ;;  %v1470_v32 = vld [vmem:[#allocation10 + $0x3e8] sm:$0xff]  ;;  %v1472_v33 = vld [vmem:[#allocation10 + $0x3f8] sm:$0xff] }
 0x54e   :  { %v1334_v38 = vmul.f32 1.442695, %v1333_v34  ;;  %v1341_v28 = vmul.f32 1.442695, %v1340_v19  ;;  %v1475_v34 = vld [vmem:[#allocation10 + $0x410] sm:$0xff] }
 0x54f   :  { %2722 = vpow2.f32 %v1327_v35 }
 0x550   :  { %2724 = vpow2.f32 %v1789_v36 }
 0x551   :  { %2726 = vpow2.f32 %v1334_v38  ;;  %v1471_v38 = vld [vmem:[#allocation10 + $0x3f0] sm:$0xff] }
 0x559   :  { %v2723_v39 = vpop.eup %2722 }
 0x55a   :  { %v2725_v40 = vpop.eup %2724  ;;  %v1815_v41 = vadd.f32 -1.0, %v2723_v39  ;;  %v2613_v39 = vpack.c.bf16 %v1475_v34, %v1472_v33 }
 0x55b   :  { %v2727_v42 = vpop.eup %2726  ;;  %v1791_v43 = vadd.f32 1.0, %v2725_v40  ;;  %v1474_v40 = vld [vmem:[#allocation10 + $0x408] sm:$0xff] }
 0x55c   :  { %v1816_v45 = vadd.f32 -1.0, %v2727_v42  ;;  %v1330_v49 = vmul.f32 0.25, %v1815_v41  ;;  %v1473_v41 = vld [vmem:[#allocation10 + $0x400] sm:$0xff]  ;;  %v1476_v42 = vld [vmem:[#allocation10 + $0x418] sm:$0xff] }
 0x55d   :  { %2728 = vrcp.f32 %v1791_v43  ;;  %v1478_v43 = vld [vmem:[#allocation10 + $0x428] sm:$0xff]  ;;  %v2673_v46 = vpack.c.bf16 %v1476_v42, %v1473_v41 }
 0x55e   :  { %v1337_v57 = vmul.f32 0.25, %v1816_v45  ;;  %v1331_v6 = vsel %vm1325_vm8, %v2681_v5, %v1330_v49  ;;  %v1465_v5 = vld [vmem:[#allocation10 + $0x3c0] sm:$0xff]  ;;  %2730 = vpow2.f32 %v1341_v28  ;;  %v2615_v45 = vpack.c.bf16 %v1474_v40, %v1471_v38  ;;  %v1480_v49 = vld [vmem:[#allocation10 + $0x438] sm:$0xff] }
 0x55f   :  { %v2611_v35 = vpack.c.bf16 %v1468_v30, %v1465_v5  ;;  %v2617_v48 = vpack.c.bf16 %v1481_v44, %v1478_v43 }
 0x560   :  { %v1338_v61 = vsel %vm1332_vm7, %v2682_v31, %v1337_v57  ;;  %v1467_v31 = vld [vmem:[#allocation10 + $0x3d0] sm:$0xff]  ;;  %v1484_v57 = vld [vmem:[#allocation10 + $0x458] sm:$0xff] }
 0x561   :  { %1570 = vmatprep.mubr.f32.mxu0 %v1338_v61  ;;  %1712 = vmatprep.mubr.f32.mxu1 %v1338_v61  ;;  %v2670_v36 = vpack.c.bf16 %v1470_v32, %v1467_v31 }
 0x562   :  { %1571 = vmatmul.mubr.f32.vlgmr.msra.gmra.mrb[8].mxu0 %v1331_v6  ;;  %1713 = vmatmul.mubr.f32.vlgmr.msra.gmra.mrb[8].mxu1 %v1331_v6 }
 0x563   :  { %2596 = vmatpush1.bf16.msra.mxu0 %v2595_v58  ;;  %2659 = vmatpush3.bf16.msra.mxu1 %v2658_v24  ;;  %v1487_v58 = vld [vmem:[#allocation10 + $0x470] sm:$0xff]  ;;  %v2619_v24 = vpack.c.bf16 %v1480_v49, %v1477_v47 }
 0x564   :  { %2598 = vmatprep.subr.bf16.mxu0 %v2597_v63  ;;  %2660 = vmatprep.subr.bf16.mxu1 %v2886_v0  ;;  %v2621_v61 = vpack.c.bf16 %v1487_v58, %v1484_v57  ;;  %v1486_v63 = vld [vmem:[#allocation10 + $0x468] sm:$0xff] }
 0x565   :  { %1641 = vmatprep.mubr.f32.mxu0 %v2888_v1  ;;  %2110 = vmatprep.mubr.msk.f32.mxu1 %vm2887_vm0, %v2888_v1  ;;  %v1466_v1 = vld [vmem:[#allocation10 + $0x3c8] sm:$0xff]  ;;  %v2623_v6 = vpack.c.bf16 %v1486_v63, %v1483_v60 }
 0x566   :  { %v2609_v29 = vpack.c.bf16 %v1469_v25, %v1466_v1 }
 0x567   :  { %v2729_v16 = vpop.eup %2728  ;;  %2600 = vmatpush1.bf16.msra.mxu0 %v2599_v8  ;;  %2662 = vmatpush3.bf16.msra.mxu1 %v2661_v9 }
 0x568   :  { %1796 = vst [vmem:[%s3207_s13 + $0x18] sm:$0xff] %v2729_v16  ;;  %2602 = vmatprep.subr.bf16.mxu0 %v2601_v50  ;;  %2663 = vmatprep.subr.bf16.mxu1 %v2886_v0  ;;  %v2731_v4 = vpop.eup %2730 }
 0x569   :  { %v1817_v53 = vadd.f32 -1.0, %v2731_v4 }
 0x56b   :  { %2604 = vmatpush1.bf16.msra.mxu0 %v2603_v17  ;;  %2665 = vmatpush3.bf16.msra.mxu1 %v2664_v62  ;;  %v1344_v8 = vsel %vm1339_vm9, %v3161_v11, %v1817_v53 }
 0x56c   :  { %2606 = vmatprep.subr.bf16.mxu0 %v2605_v20  ;;  %2666 = vmatprep.subr.bf16.mxu1 %v2886_v0 }
 0x56f   :  { %2608 = vmatpush1.bf16.msra.mxu0 %v2607_v26  ;;  %2668 = vmatpush3.bf16.msra.mxu1 %v2667_v27 }
 0x570   :  { %2610 = vmatprep.subr.bf16.mxu0 %v2609_v29  ;;  %2669 = vmatprep.subr.bf16.mxu1 %v2886_v0 }
 0x573   :  { %2612 = vmatpush1.bf16.msra.mxu0 %v2611_v35  ;;  %2671 = vmatpush3.bf16.msra.mxu1 %v2670_v36 }
 0x574   :  { %2614 = vmatprep.subr.bf16.mxu0 %v2613_v39  ;;  %2672 = vmatprep.subr.bf16.mxu1 %v2886_v0 }
 0x577   :  { %2616 = vmatpush1.bf16.msra.mxu0 %v2615_v45  ;;  %2674 = vmatpush3.bf16.msra.mxu1 %v2673_v46 }
 0x578   :  { %2618 = vmatprep.subr.bf16.mxu0 %v2617_v48  ;;  %2675 = vmatprep.subr.bf16.mxu1 %v2886_v0 }
 0x57b   :  { %2620 = vmatpush1.bf16.msra.mxu0 %v2619_v24  ;;  %2677 = vmatpush3.bf16.msra.mxu1 %v2676_v59 }
 0x57c   :  { %2622 = vmatprep.subr.bf16.mxu0 %v2621_v61  ;;  %2678 = vmatprep.subr.bf16.mxu1 %v2886_v0  ;;  %v1494_v0 = vrot.slane %v1489_v37, %v3116_v51 }
 0x57f   :  { %2624 = vmatpush1.bf16.msra.mxu0 %v2623_v6  ;;  %2680 = vmatpush3.bf16.msra.mxu1 %v2679_v7 }
 0x582   :  { %1642 = vmatmul.mubr.f32.vlgmr.msra.gmra.mrb[8].mxu0 %v1344_v8  ;;  %2111 = vmatmul.mubr.f32.vlgmr.msra.gmra.mrb[10].mxu1 %v1344_v8 }
 0x635   :  { %v1918_v9 = vpop.f32.mrb[8].mxu1 }
 0x636   :  { %v1919_v10 = vpop.f32.mrb[9].mxu1 }
 0x637   :  { %v1920_v50 = vadd.f32 %v1919_v10, %v1918_v9 }
 0x639   :  { %v1715_v14 = vadd.f32 %v1920_v50, %v1502_v12 }
 0x655   :  { %v1643_v15 = vpop.f32.mrb[8].mxu0  ;;  %v1784_v16 = vpop.f32.mrb[10].mxu1 }
 0x656   :  { %v2685_v17 = vadd.f32 %v1643_v15, %v1494_v0  ;;  %v1785_v11 = vadd.f32 %v1784_v16, %v1715_v14  ;;  %v1645_v62 = vpop.f32.mrb[9].mxu0  ;;  %v2112_v18 = vpop.f32.mrb[11].mxu1 }
 0x657   :  { %v2686_v19 = vadd.f32 %v1645_v62, %v1498_v13 }
 0x658   :  { %1793 = vst [vmem:[%s3207_s13] sm:$0xff] %v2685_v17  ;;  %1797 = vst [vmem:[%s3207_s13 + $0x20] sm:$0xff] %v1785_v11 }
 0x659   :  { %1794 = vst [vmem:[%s3207_s13 + $0x8] sm:$0xff] %v2686_v19 }
 0x65a   :  { %1802 = vsyncpa [#allocation3], 1 }
 0x65b   :  { %1803 = vsyncpa [#allocation5], 1 }
 0x65c   :  { %1804 = vsyncpa [#allocation8], 1 }
 0x65d   :  { %1805 = vsyncpa [#allocation11], 1 }

</bundles_post_ra>
